<compile_context>
chip_gen: v7x
topology: tpu7x:2x2x1
jax: 0.10.0
libtpu: 0.0.40
codegen_flags: <defaults>
</compile_context>

<pallas_src>
import functools
import math

import jax
import jax.numpy as jnp
from jax.experimental import pallas as pl
from jax.experimental.pallas import tpu as pltpu


def _window_attn_kernel(num_heads, x_ref, wqkv_ref, bqkv_ref, wproj_ref,
                        bproj_ref, bias_ref, o_ref, acc_ref):
    """One grid step == Bw windows, shape (Bw, N, C)."""
    Bw, N, C = x_ref.shape
    hd = C // num_heads
    nB = bias_ref.shape[1]            # mask groups folded into the bias table (nW or 1)
    G = Bw // nB                      # windows per mask group in this slab
    cdt = x_ref.dtype                 # compute dtype for MXU operands (bf16 fast path)

    # ---- QKV projection: one big (Bw*N, C) @ (C, 3C) MXU matmul, f32 accumulate ----
    x2d = x_ref[...].reshape(Bw * N, C)
    qkv = jnp.dot(x2d, wqkv_ref[...], preferred_element_type=jnp.float32)
    qkv = qkv + bqkv_ref[...].astype(jnp.float32)        # scale pre-folded into Q part

    acc_ref[...] = jnp.zeros_like(acc_ref)               # f32 output-proj accumulator

    # ---- per-head attention, batched over the Bw windows ---------------------------
    for h in range(num_heads):                            # small static loop
        qh = qkv[:, h * hd:(h + 1) * hd].astype(cdt).reshape(Bw, N, hd)
        kh = qkv[:, C + h * hd:C + (h + 1) * hd].astype(cdt).reshape(Bw, N, hd)
        vh = qkv[:, 2 * C + h * hd:2 * C + (h + 1) * hd].astype(cdt).reshape(Bw, N, hd)

        s = jnp.einsum('bnd,bmd->bnm', qh, kh,
                       preferred_element_type=jnp.float32)           # (Bw, N, N) f32

        # per-head slice of the resident (H, nB, N, N) bias(+mask) table;
        # group broadcast via a cheap leading-dim reshape (no tiled table in VMEM).
        bias_h = bias_ref[h].astype(jnp.float32)                     # (nB, N, N)
        s = (s.reshape(G, nB, N, N) + bias_h[None]).reshape(Bw, N, N)

        # numerically-stable softmax; normalization deferred to the head output
        s = s - jnp.max(s, axis=-1, keepdims=True)
        p = jnp.exp(s)
        l = jnp.sum(p, axis=-1, keepdims=True)                       # (Bw, N, 1)

        oh = jnp.einsum('bnm,bmd->bnd', p.astype(cdt), vh,
                        preferred_element_type=jnp.float32)           # (Bw, N, hd) f32
        oh = oh * pl.reciprocal(l, approx=False)   # exact; only Bw*N rows -> negligible

        # head-concat folded into the output projection: acc += oh @ Wproj[h]
        acc_ref[...] += jnp.dot(oh.reshape(Bw * N, hd).astype(cdt), wproj_ref[h],
                                preferred_element_type=jnp.float32)

    y = acc_ref[...] + bproj_ref[...].astype(jnp.float32)
    o_ref[...] = y.reshape(Bw, N, C).astype(o_ref.dtype)


def _pick_bw(B_, N, group, target_rows):
    """Windows per grid step (a multiple of `group`) and the padded window count."""
    # largest multiple of `group` whose row count fits target_rows
    bw = max(group, (max(target_rows // N, 1) // group) * group)
    # keep at least 2 grid steps whenever possible (v7x megacore shards the grid)
    if B_ > group:
        half = math.ceil(math.ceil(B_ / 2) / group) * group
        bw = min(bw, half)
    bw = min(bw, math.ceil(B_ / group) * group)
    b_pad = math.ceil(B_ / bw) * bw
    return bw, b_pad


def window_attention(x, params, window_size, num_heads, mask=None, *, target_rows=256):
    """x: (B_, N, C); mask: (nW, N, N) 0/-inf style or None. Returns (B_, N, C).

    target_rows controls how many activation rows (Bw*N) one grid step handles:
    256 fills the 2x256 MXU on v6e/v7x and is already generous for v5e's 4x128 MXU.
    """
    B_, N, C = x.shape
    assert N == window_size[0] * window_size[1]
    assert C % num_heads == 0
    H = num_heads
    hd = C // H
    scale = hd ** (-0.5)

    wqkv = params["wqkv"]                       # (C, 3C)   (already (in, out))
    bqkv = params["bqkv"]                       # (3C,)
    wproj = params["wproj"]                     # (C, C)
    bproj = params["bproj"]                     # (C,)
    relbias = params["relbias"].astype(jnp.float32)   # (H, N, N), precomputed gather

    # ---- one-time host-side constant folds ------------------------------------------
    # fold `scale` into the Q columns of the QKV projection (weights AND bias)
    col_scale = jnp.concatenate([jnp.full((C,), scale, jnp.float32),
                                 jnp.ones((2 * C,), jnp.float32)])
    wqkv_s = (wqkv.astype(jnp.float32) * col_scale[None, :]).astype(wqkv.dtype)
    bqkv_s = (bqkv.astype(jnp.float32) * col_scale).astype(bqkv.dtype).reshape(1, 3 * C)
    # head-major output projection so the head concat can be folded into it
    wproj_h = wproj.reshape(H, hd, C)
    bproj_r = bproj.reshape(1, C)

    # relative-position bias (+ optional shift mask) -> ONE resident table (H, nB, N, N)
    if mask is not None:
        nB = mask.shape[0]
        bias = relbias[:, None, :, :] + mask.astype(jnp.float32)[None, :, :, :]
    else:
        nB = 1
        bias = relbias[:, None, :, :]

    # ---- windows per grid step; pad B_ on the host instead of a Bw=1 fallback -------
    Bw, B_pad = _pick_bw(B_, N, nB, target_rows)
    x_in = x if B_pad == B_ else jnp.concatenate(
        [x, jnp.zeros((B_pad - B_, N, C), x.dtype)], axis=0)
    grid = B_pad // Bw

    # ---- VMEM budget & cost estimate --------------------------------------------------
    x_item = jnp.dtype(x.dtype).itemsize
    w_item = jnp.dtype(wqkv.dtype).itemsize
    slab_bytes = Bw * N * C * x_item
    weight_bytes = (C * 3 * C + 3 * C + C * C + C) * w_item + H * nB * N * N * 4
    vmem_est = (2 * 2 * slab_bytes            # double-buffered x + out slabs
                + 2 * weight_bytes            # resident weights / bias (pessimistic 2x)
                + Bw * N * C * 4              # f32 scratch accumulator
                + Bw * N * 3 * C * 4          # f32 qkv intermediate
                + (4 << 20))                  # headroom for compiler scratch / spills
    vmem_limit = int(min(96 << 20, max(32 << 20, 2 * vmem_est)))

    flops = int(2 * B_pad * N * C * 3 * C            # QKV projection
                + 4 * B_pad * H * N * N * hd         # q@k^T and p@v
                + 2 * B_pad * N * C * C)             # output projection
    cost = pl.CostEstimate(
        flops=flops,
        transcendentals=int(B_pad * H * N * N),      # exp
        bytes_accessed=int(2 * B_pad * N * C * x_item + weight_bytes))

    kernel = functools.partial(_window_attn_kernel, num_heads)

    out = pl.pallas_call(
        kernel,
        out_shape=jax.ShapeDtypeStruct((B_pad, N, C), x.dtype),
        grid_spec=pltpu.PrefetchScalarGridSpec(
            num_scalar_prefetch=0,
            grid=(grid,),
            in_specs=[
                pl.BlockSpec((Bw, N, C), lambda b: (b, 0, 0)),        # x slab
                pl.BlockSpec((C, 3 * C), lambda b: (0, 0)),           # wqkv  (resident)
                pl.BlockSpec((1, 3 * C), lambda b: (0, 0)),           # bqkv  (resident)
                pl.BlockSpec((H, hd, C), lambda b: (0, 0, 0)),        # wproj (resident, head-major)
                pl.BlockSpec((1, C), lambda b: (0, 0)),               # bproj (resident)
                pl.BlockSpec((H, nB, N, N), lambda b: (0, 0, 0, 0)),  # bias(+mask), resident
            ],
            out_specs=pl.BlockSpec((Bw, N, C), lambda b: (b, 0, 0)),
            scratch_shapes=[pltpu.VMEM((Bw * N, C), jnp.float32)],
        ),
        compiler_params=pltpu.CompilerParams(
            dimension_semantics=("parallel",),
            vmem_limit_bytes=vmem_limit),
        cost_estimate=cost,
    )(x_in, wqkv_s, bqkv_s, wproj_h, bproj_r, bias)

    return out if B_pad == B_ else out[:B_]


def make_relative_position_index(window_size):
    Wh, Ww = window_size
    coords_h = jnp.arange(Wh)
    coords_w = jnp.arange(Ww)
    coords = jnp.stack(jnp.meshgrid(coords_h, coords_w, indexing="ij"))   # (2, Wh, Ww)
    coords_flatten = coords.reshape(2, -1)                                # (2, N)
    rel = coords_flatten[:, :, None] - coords_flatten[:, None, :]         # (2, N, N)
    rel = rel.transpose(1, 2, 0)                                          # (N, N, 2)
    rel = rel.at[:, :, 0].add(Wh - 1)
    rel = rel.at[:, :, 1].add(Ww - 1)
    rel = rel.at[:, :, 0].multiply(2 * Ww - 1)
    return rel.sum(-1)                                                    # (N, N)


def init_params(key, dim, window_size, num_heads):
    Wh, Ww = window_size
    N = Wh * Ww
    k1, k2, k3, k4, k5, k6 = jax.random.split(key, 6)
    table_size = (2 * Wh - 1) * (2 * Ww - 1)
    # trunc_normal_(std=0.02) equivalent
    table = 0.02 * jax.random.truncated_normal(k1, -2.0, 2.0, (table_size, num_heads),
                                               dtype=jnp.float32)
    # deterministic synthetic Linear weights, stored as (in, out)
    wqkv = 0.02 * jax.random.normal(k2, (dim, 3 * dim), dtype=jnp.float32)
    bqkv = 0.02 * jax.random.normal(k3, (3 * dim,), dtype=jnp.float32)
    wproj = 0.02 * jax.random.normal(k4, (dim, dim), dtype=jnp.float32)
    bproj = 0.02 * jax.random.normal(k5, (dim,), dtype=jnp.float32)

    # precompute relative position bias gather (glue, plain JAX)
    rpi = make_relative_position_index(window_size)                       # (N, N)
    relbias = table[rpi.reshape(-1)].reshape(N, N, num_heads)
    relbias = jnp.transpose(relbias, (2, 0, 1))                           # (H, N, N)

    return {"wqkv": wqkv, "bqkv": bqkv, "wproj": wproj, "bproj": bproj,
            "relbias": relbias}, k6


def reference_window_attention(x, params, window_size, num_heads, mask=None):
    """Pure-JAX reference replicating the PyTorch forward."""
    B_, N, C = x.shape
    hd = C // num_heads
    scale = hd ** (-0.5)
    qkv = x @ params["wqkv"] + params["bqkv"]                             # (B_, N, 3C)
    qkv = qkv.reshape(B_, N, 3, num_heads, hd).transpose(2, 0, 3, 1, 4)   # (3, B_, H, N, hd)
    q, k, v = qkv[0], qkv[1], qkv[2]
    q = q * scale
    attn = jnp.einsum("bhnd,bhmd->bhnm", q, k)
    attn = attn + params["relbias"][None, :, :, :]
    if mask is not None:
        nW = mask.shape[0]
        attn = attn.reshape(B_ // nW, nW, num_heads, N, N) + mask[None, :, None, :, :]
        attn = attn.reshape(B_, num_heads, N, N)
    attn = jax.nn.softmax(attn, axis=-1)
    out = jnp.einsum("bhnm,bhmd->bhnd", attn, v)
    out = out.transpose(0, 2, 1, 3).reshape(B_, N, C)
    return out @ params["wproj"] + params["bproj"]


if __name__ == "__main__":
    dim = 32
    num_heads = 4
    window_size = (4, 4)
    N = window_size[0] * window_size[1]
    B = 2
    nW = 4
    B_ = B * nW                                                           # 8 windows

    key = jax.random.PRNGKey(0)
    params, key = init_params(key, dim, window_size, num_heads)

    kx, kmask = jax.random.split(key)
    x = jax.random.normal(kx, (B_, N, dim), dtype=jnp.float32)

    # 0 / -inf style shift mask (use -100.0, as Swin does in practice)
    mask_bits = jax.random.bernoulli(kmask, 0.2, (nW, N, N))
    mask = jnp.where(mask_bits, -100.0, 0.0).astype(jnp.float32)

    # pure-JAX reference
    r0 = reference_window_attention(x, params, window_size, num_heads, mask=None)
    r1 = reference_window_attention(x, params, window_size, num_heads, mask=mask)

    # default config: Bw=4 -> grid=2 (exercises the multi-step / megacore path)
    y0 = jax.block_until_ready(window_attention(x, params, window_size, num_heads, mask=None))
    y1 = jax.block_until_ready(window_attention(x, params, window_size, num_heads, mask=mask))

    # non-divisible window count -> host-side padding path (no Bw=1 fallback)
    x7 = x[:7]
    r2 = reference_window_attention(x7, params, window_size, num_heads, mask=None)
    y2 = jax.block_until_ready(window_attention(x7, params, window_size, num_heads, mask=None))

    tol = dict(atol=2e-3, rtol=2e-3)
    assert y0.shape == r0.shape and jnp.allclose(y0, r0, **tol), "no-mask mismatch"
    assert jnp.allclose(y1, r1, **tol), "mask mismatch"
    assert y2.shape == r2.shape and jnp.allclose(y2, r2, **tol), "padded (B_=7) mismatch"

    # bf16 fast path: attention matmuls run as bf16 MXU ops with f32 accumulation
    xb = x.astype(jnp.bfloat16)
    pb = dict(params)
    for kname in ("wqkv", "bqkv", "wproj", "bproj"):
        pb[kname] = params[kname].astype(jnp.bfloat16)
    yb = jax.block_until_ready(window_attention(xb, pb, window_size, num_heads, mask=mask))
    assert yb.dtype == jnp.bfloat16
    assert jnp.allclose(yb.astype(jnp.float32), r1, atol=1e-2, rtol=5e-2), "bf16 path mismatch"

    print("KERNEL_OK")
</pallas_src>

<mosaic_0001>
module attributes {stable_mosaic.version = 11 : i64} {
  func.func @_window_attn_kernel(%arg0: i32, %arg1: memref<4x16x32xf32, #tpu.memory_space<vmem>>, %arg2: memref<32x96xf32, #tpu.memory_space<vmem>>, %arg3: memref<1x96xf32, #tpu.memory_space<vmem>>, %arg4: memref<4x8x32xf32, #tpu.memory_space<vmem>>, %arg5: memref<1x32xf32, #tpu.memory_space<vmem>>, %arg6: memref<4x1x16x16xf32, #tpu.memory_space<vmem>>, %arg7: memref<4x16x32xf32, #tpu.memory_space<vmem>>, %arg8: memref<64x32xf32, #tpu.memory_space<vmem>>) attributes {dimension_semantics = [#tpu.dimension_semantics<parallel>], iteration_bounds = array<i64: 2>, scalar_prefetch = 0 : i64, scratch_operands = 1 : i64, tpu.core_type = #tpu.core_type<tc>, window_params = [{transform_indices = @transform_0, window_bounds = array<i64: 4, 16, 32>}, {pipeline_mode = #tpu.pipeline_mode<synchronous>, transform_indices = @transform_1, window_bounds = array<i64: 32, 96>}, {pipeline_mode = #tpu.pipeline_mode<synchronous>, transform_indices = @transform_2, window_bounds = array<i64: 1, 96>}, {pipeline_mode = #tpu.pipeline_mode<synchronous>, transform_indices = @transform_3, window_bounds = array<i64: 4, 8, 32>}, {pipeline_mode = #tpu.pipeline_mode<synchronous>, transform_indices = @transform_4, window_bounds = array<i64: 1, 32>}, {pipeline_mode = #tpu.pipeline_mode<synchronous>, transform_indices = @transform_5, window_bounds = array<i64: 4, 1, 16, 16>}, {transform_indices = @transform_6, window_bounds = array<i64: 4, 16, 32>}]} {
    %c0 = arith.constant 0 : index
    %c0_0 = arith.constant 0 : index
    %c0_1 = arith.constant 0 : index
    %0 = vector.load %arg1[%c0, %c0_0, %c0_1] : memref<4x16x32xf32, #tpu.memory_space<vmem>>, vector<4x16x32xf32>
    %1 = vector.shape_cast %0 : vector<4x16x32xf32> to vector<64x32xf32>
    %c0_2 = arith.constant 0 : index
    %c0_3 = arith.constant 0 : index
    %2 = vector.load %arg2[%c0_2, %c0_3] : memref<32x96xf32, #tpu.memory_space<vmem>>, vector<32x96xf32>
    %cst = arith.constant dense<0.000000e+00> : vector<64x96xf32>
    %3 = tpu.matmul %1, %2, %cst {dimension_numbers = #tpu.dot_dimension_numbers<[1], [0], [0], [1], [0, 0, 1, 1], [], []>} : vector<64x32xf32>, vector<32x96xf32>, vector<64x96xf32> -> vector<64x96xf32>
    %c0_4 = arith.constant 0 : index
    %c0_5 = arith.constant 0 : index
    %4 = vector.load %arg3[%c0_4, %c0_5] : memref<1x96xf32, #tpu.memory_space<vmem>>, vector<1x96xf32>
    %5 = vector.broadcast %4 : vector<1x96xf32> to vector<64x96xf32>
    %6 = arith.addf %3, %5 : vector<64x96xf32>
    %cst_6 = arith.constant 0.000000e+00 : f32
    %7 = vector.broadcast %cst_6 : f32 to vector<64x32xf32>
    %c0_7 = arith.constant 0 : index
    %c0_8 = arith.constant 0 : index
    %8 = vector.load %arg8[%c0_7, %c0_8] : memref<64x32xf32, #tpu.memory_space<vmem>>, vector<64x32xf32>
    tpu.vector_store %arg8[%c0_7, %c0_8], %7 {strides = array<i32>} : memref<64x32xf32, #tpu.memory_space<vmem>>, vector<64x32xf32>,
    %9 = vector.extract_strided_slice %6 {offsets = [0, 0], sizes = [64, 8], strides = [1, 1]} : vector<64x96xf32> to vector<64x8xf32>
    %10 = vector.shape_cast %9 : vector<64x8xf32> to vector<4x16x8xf32>
    %11 = vector.extract_strided_slice %6 {offsets = [0, 32], sizes = [64, 8], strides = [1, 1]} : vector<64x96xf32> to vector<64x8xf32>
    %12 = vector.shape_cast %11 : vector<64x8xf32> to vector<4x16x8xf32>
    %13 = vector.extract_strided_slice %6 {offsets = [0, 64], sizes = [64, 8], strides = [1, 1]} : vector<64x96xf32> to vector<64x8xf32>
    %14 = vector.shape_cast %13 : vector<64x8xf32> to vector<4x16x8xf32>
    "tpu.trace_start"() <{level = 10 : i32, message = "bnd,bmd->bnm"}> : () -> ()
    %cst_9 = arith.constant dense<0.000000e+00> : vector<4x16x16xf32>
    %15 = tpu.matmul %10, %12, %cst_9 {dimension_numbers = #tpu.dot_dimension_numbers<[2], [2], [1], [1], [0, 0, 0, 1, 1, 1], [0], [0]>} : vector<4x16x8xf32>, vector<4x16x8xf32>, vector<4x16x16xf32> -> vector<4x16x16xf32>
    "tpu.trace_stop"() : () -> ()
    %c0_10 = arith.constant 0 : index
    %c0_11 = arith.constant 0 : index
    %c0_12 = arith.constant 0 : index
    %c0_13 = arith.constant 0 : index
    %16 = vector.load %arg6[%c0_10, %c0_11, %c0_12, %c0_13] : memref<4x1x16x16xf32, #tpu.memory_space<vmem>>, vector<1x1x16x16xf32>
    %17 = vector.shape_cast %16 : vector<1x1x16x16xf32> to vector<1x16x16xf32>
    %18 = vector.shape_cast %15 : vector<4x16x16xf32> to vector<4x1x16x16xf32>
    %19 = vector.shape_cast %17 : vector<1x16x16xf32> to vector<1x1x16x16xf32>
    %20 = vector.broadcast %19 : vector<1x1x16x16xf32> to vector<4x1x16x16xf32>
    %21 = arith.addf %18, %20 : vector<4x1x16x16xf32>
    %22 = vector.shape_cast %21 : vector<4x1x16x16xf32> to vector<4x16x16xf32>
    %cst_14 = arith.constant dense<0xFF800000> : vector<4x16xf32>
    %23 = vector.multi_reduction <maximumf>, %22, %cst_14 [2] : vector<4x16x16xf32> to vector<4x16xf32>
    %24 = vector.shape_cast %23 : vector<4x16xf32> to vector<4x16x1xf32>
    %25 = vector.broadcast %24 : vector<4x16x1xf32> to vector<4x16x16xf32>
    %26 = arith.subf %22, %25 : vector<4x16x16xf32>
    %27 = math.exp %26 : vector<4x16x16xf32>
    %cst_15 = arith.constant dense<0.000000e+00> : vector<4x16xf32>
    %28 = vector.multi_reduction <add>, %27, %cst_15 [2] : vector<4x16x16xf32> to vector<4x16xf32>
    %29 = vector.shape_cast %28 : vector<4x16xf32> to vector<4x16x1xf32>
    "tpu.trace_start"() <{level = 10 : i32, message = "bnm,bmd->bnd"}> : () -> ()
    %cst_16 = arith.constant dense<0.000000e+00> : vector<4x16x8xf32>
    %30 = tpu.matmul %27, %14, %cst_16 {dimension_numbers = #tpu.dot_dimension_numbers<[2], [1], [1], [2], [0, 0, 0, 1, 1, 2], [0], [0]>} : vector<4x16x16xf32>, vector<4x16x8xf32>, vector<4x16x8xf32> -> vector<4x16x8xf32>
    "tpu.trace_stop"() : () -> ()
    %31 = tpu.reciprocal %29 : vector<4x16x1xf32> -> vector<4x16x1xf32>
    %32 = vector.broadcast %31 : vector<4x16x1xf32> to vector<4x16x8xf32>
    %33 = arith.mulf %30, %32 : vector<4x16x8xf32>
    %c0_17 = arith.constant 0 : index
    %c0_18 = arith.constant 0 : index
    %34 = vector.load %arg8[%c0_17, %c0_18] : memref<64x32xf32, #tpu.memory_space<vmem>>, vector<64x32xf32>
    %35 = vector.shape_cast %33 : vector<4x16x8xf32> to vector<64x8xf32>
    %c0_19 = arith.constant 0 : index
    %c0_20 = arith.constant 0 : index
    %c0_21 = arith.constant 0 : index
    %36 = vector.load %arg4[%c0_19, %c0_20, %c0_21] : memref<4x8x32xf32, #tpu.memory_space<vmem>>, vector<1x8x32xf32>
    %37 = vector.shape_cast %36 : vector<1x8x32xf32> to vector<8x32xf32>
    %cst_22 = arith.constant dense<0.000000e+00> : vector<64x32xf32>
    %38 = tpu.matmul %35, %37, %cst_22 {dimension_numbers = #tpu.dot_dimension_numbers<[1], [0], [0], [1], [0, 0, 1, 1], [], []>} : vector<64x8xf32>, vector<8x32xf32>, vector<64x32xf32> -> vector<64x32xf32>
    %39 = arith.addf %34, %38 : vector<64x32xf32>
    %c0_23 = arith.constant 0 : index
    %c0_24 = arith.constant 0 : index
    %40 = vector.load %arg8[%c0_23, %c0_24] : memref<64x32xf32, #tpu.memory_space<vmem>>, vector<64x32xf32>
    tpu.vector_store %arg8[%c0_23, %c0_24], %39 {strides = array<i32>} : memref<64x32xf32, #tpu.memory_space<vmem>>, vector<64x32xf32>,
    %41 = vector.extract_strided_slice %6 {offsets = [0, 8], sizes = [64, 8], strides = [1, 1]} : vector<64x96xf32> to vector<64x8xf32>
    %42 = vector.shape_cast %41 : vector<64x8xf32> to vector<4x16x8xf32>
    %43 = vector.extract_strided_slice %6 {offsets = [0, 40], sizes = [64, 8], strides = [1, 1]} : vector<64x96xf32> to vector<64x8xf32>
    %44 = vector.shape_cast %43 : vector<64x8xf32> to vector<4x16x8xf32>
    %45 = vector.extract_strided_slice %6 {offsets = [0, 72], sizes = [64, 8], strides = [1, 1]} : vector<64x96xf32> to vector<64x8xf32>
    %46 = vector.shape_cast %45 : vector<64x8xf32> to vector<4x16x8xf32>
    "tpu.trace_start"() <{level = 10 : i32, message = "bnd,bmd->bnm"}> : () -> ()
    %cst_25 = arith.constant dense<0.000000e+00> : vector<4x16x16xf32>
    %47 = tpu.matmul %42, %44, %cst_25 {dimension_numbers = #tpu.dot_dimension_numbers<[2], [2], [1], [1], [0, 0, 0, 1, 1, 1], [0], [0]>} : vector<4x16x8xf32>, vector<4x16x8xf32>, vector<4x16x16xf32> -> vector<4x16x16xf32>
    "tpu.trace_stop"() : () -> ()
    %c1 = arith.constant 1 : index
    %c0_26 = arith.constant 0 : index
    %c0_27 = arith.constant 0 : index
    %c0_28 = arith.constant 0 : index
    %48 = vector.load %arg6[%c1, %c0_26, %c0_27, %c0_28] : memref<4x1x16x16xf32, #tpu.memory_space<vmem>>, vector<1x1x16x16xf32>
    %49 = vector.shape_cast %48 : vector<1x1x16x16xf32> to vector<1x16x16xf32>
    %50 = vector.shape_cast %47 : vector<4x16x16xf32> to vector<4x1x16x16xf32>
    %51 = vector.shape_cast %49 : vector<1x16x16xf32> to vector<1x1x16x16xf32>
    %52 = vector.broadcast %51 : vector<1x1x16x16xf32> to vector<4x1x16x16xf32>
    %53 = arith.addf %50, %52 : vector<4x1x16x16xf32>
    %54 = vector.shape_cast %53 : vector<4x1x16x16xf32> to vector<4x16x16xf32>
    %cst_29 = arith.constant dense<0xFF800000> : vector<4x16xf32>
    %55 = vector.multi_reduction <maximumf>, %54, %cst_29 [2] : vector<4x16x16xf32> to vector<4x16xf32>
    %56 = vector.shape_cast %55 : vector<4x16xf32> to vector<4x16x1xf32>
    %57 = vector.broadcast %56 : vector<4x16x1xf32> to vector<4x16x16xf32>
    %58 = arith.subf %54, %57 : vector<4x16x16xf32>
    %59 = math.exp %58 : vector<4x16x16xf32>
    %cst_30 = arith.constant dense<0.000000e+00> : vector<4x16xf32>
    %60 = vector.multi_reduction <add>, %59, %cst_30 [2] : vector<4x16x16xf32> to vector<4x16xf32>
    %61 = vector.shape_cast %60 : vector<4x16xf32> to vector<4x16x1xf32>
    "tpu.trace_start"() <{level = 10 : i32, message = "bnm,bmd->bnd"}> : () -> ()
    %cst_31 = arith.constant dense<0.000000e+00> : vector<4x16x8xf32>
    %62 = tpu.matmul %59, %46, %cst_31 {dimension_numbers = #tpu.dot_dimension_numbers<[2], [1], [1], [2], [0, 0, 0, 1, 1, 2], [0], [0]>} : vector<4x16x16xf32>, vector<4x16x8xf32>, vector<4x16x8xf32> -> vector<4x16x8xf32>
    "tpu.trace_stop"() : () -> ()
    %63 = tpu.reciprocal %61 : vector<4x16x1xf32> -> vector<4x16x1xf32>
    %64 = vector.broadcast %63 : vector<4x16x1xf32> to vector<4x16x8xf32>
    %65 = arith.mulf %62, %64 : vector<4x16x8xf32>
    %c0_32 = arith.constant 0 : index
    %c0_33 = arith.constant 0 : index
    %66 = vector.load %arg8[%c0_32, %c0_33] : memref<64x32xf32, #tpu.memory_space<vmem>>, vector<64x32xf32>
    %67 = vector.shape_cast %65 : vector<4x16x8xf32> to vector<64x8xf32>
    %c1_34 = arith.constant 1 : index
    %c0_35 = arith.constant 0 : index
    %c0_36 = arith.constant 0 : index
    %68 = vector.load %arg4[%c1_34, %c0_35, %c0_36] : memref<4x8x32xf32, #tpu.memory_space<vmem>>, vector<1x8x32xf32>
    %69 = vector.shape_cast %68 : vector<1x8x32xf32> to vector<8x32xf32>
    %cst_37 = arith.constant dense<0.000000e+00> : vector<64x32xf32>
    %70 = tpu.matmul %67, %69, %cst_37 {dimension_numbers = #tpu.dot_dimension_numbers<[1], [0], [0], [1], [0, 0, 1, 1], [], []>} : vector<64x8xf32>, vector<8x32xf32>, vector<64x32xf32> -> vector<64x32xf32>
    %71 = arith.addf %66, %70 : vector<64x32xf32>
    %c0_38 = arith.constant 0 : index
    %c0_39 = arith.constant 0 : index
    %72 = vector.load %arg8[%c0_38, %c0_39] : memref<64x32xf32, #tpu.memory_space<vmem>>, vector<64x32xf32>
    tpu.vector_store %arg8[%c0_38, %c0_39], %71 {strides = array<i32>} : memref<64x32xf32, #tpu.memory_space<vmem>>, vector<64x32xf32>,
    %73 = vector.extract_strided_slice %6 {offsets = [0, 16], sizes = [64, 8], strides = [1, 1]} : vector<64x96xf32> to vector<64x8xf32>
    %74 = vector.shape_cast %73 : vector<64x8xf32> to vector<4x16x8xf32>
    %75 = vector.extract_strided_slice %6 {offsets = [0, 48], sizes = [64, 8], strides = [1, 1]} : vector<64x96xf32> to vector<64x8xf32>
    %76 = vector.shape_cast %75 : vector<64x8xf32> to vector<4x16x8xf32>
    %77 = vector.extract_strided_slice %6 {offsets = [0, 80], sizes = [64, 8], strides = [1, 1]} : vector<64x96xf32> to vector<64x8xf32>
    %78 = vector.shape_cast %77 : vector<64x8xf32> to vector<4x16x8xf32>
    "tpu.trace_start"() <{level = 10 : i32, message = "bnd,bmd->bnm"}> : () -> ()
    %cst_40 = arith.constant dense<0.000000e+00> : vector<4x16x16xf32>
    %79 = tpu.matmul %74, %76, %cst_40 {dimension_numbers = #tpu.dot_dimension_numbers<[2], [2], [1], [1], [0, 0, 0, 1, 1, 1], [0], [0]>} : vector<4x16x8xf32>, vector<4x16x8xf32>, vector<4x16x16xf32> -> vector<4x16x16xf32>
    "tpu.trace_stop"() : () -> ()
    %c2 = arith.constant 2 : index
    %c0_41 = arith.constant 0 : index
    %c0_42 = arith.constant 0 : index
    %c0_43 = arith.constant 0 : index
    %80 = vector.load %arg6[%c2, %c0_41, %c0_42, %c0_43] : memref<4x1x16x16xf32, #tpu.memory_space<vmem>>, vector<1x1x16x16xf32>
    %81 = vector.shape_cast %80 : vector<1x1x16x16xf32> to vector<1x16x16xf32>
    %82 = vector.shape_cast %79 : vector<4x16x16xf32> to vector<4x1x16x16xf32>
    %83 = vector.shape_cast %81 : vector<1x16x16xf32> to vector<1x1x16x16xf32>
    %84 = vector.broadcast %83 : vector<1x1x16x16xf32> to vector<4x1x16x16xf32>
    %85 = arith.addf %82, %84 : vector<4x1x16x16xf32>
    %86 = vector.shape_cast %85 : vector<4x1x16x16xf32> to vector<4x16x16xf32>
    %cst_44 = arith.constant dense<0xFF800000> : vector<4x16xf32>
    %87 = vector.multi_reduction <maximumf>, %86, %cst_44 [2] : vector<4x16x16xf32> to vector<4x16xf32>
    %88 = vector.shape_cast %87 : vector<4x16xf32> to vector<4x16x1xf32>
    %89 = vector.broadcast %88 : vector<4x16x1xf32> to vector<4x16x16xf32>
    %90 = arith.subf %86, %89 : vector<4x16x16xf32>
    %91 = math.exp %90 : vector<4x16x16xf32>
    %cst_45 = arith.constant dense<0.000000e+00> : vector<4x16xf32>
    %92 = vector.multi_reduction <add>, %91, %cst_45 [2] : vector<4x16x16xf32> to vector<4x16xf32>
    %93 = vector.shape_cast %92 : vector<4x16xf32> to vector<4x16x1xf32>
    "tpu.trace_start"() <{level = 10 : i32, message = "bnm,bmd->bnd"}> : () -> ()
    %cst_46 = arith.constant dense<0.000000e+00> : vector<4x16x8xf32>
    %94 = tpu.matmul %91, %78, %cst_46 {dimension_numbers = #tpu.dot_dimension_numbers<[2], [1], [1], [2], [0, 0, 0, 1, 1, 2], [0], [0]>} : vector<4x16x16xf32>, vector<4x16x8xf32>, vector<4x16x8xf32> -> vector<4x16x8xf32>
    "tpu.trace_stop"() : () -> ()
    %95 = tpu.reciprocal %93 : vector<4x16x1xf32> -> vector<4x16x1xf32>
    %96 = vector.broadcast %95 : vector<4x16x1xf32> to vector<4x16x8xf32>
    %97 = arith.mulf %94, %96 : vector<4x16x8xf32>
    %c0_47 = arith.constant 0 : index
    %c0_48 = arith.constant 0 : index
    %98 = vector.load %arg8[%c0_47, %c0_48] : memref<64x32xf32, #tpu.memory_space<vmem>>, vector<64x32xf32>
    %99 = vector.shape_cast %97 : vector<4x16x8xf32> to vector<64x8xf32>
    %c2_49 = arith.constant 2 : index
    %c0_50 = arith.constant 0 : index
    %c0_51 = arith.constant 0 : index
    %100 = vector.load %arg4[%c2_49, %c0_50, %c0_51] : memref<4x8x32xf32, #tpu.memory_space<vmem>>, vector<1x8x32xf32>
    %101 = vector.shape_cast %100 : vector<1x8x32xf32> to vector<8x32xf32>
    %cst_52 = arith.constant dense<0.000000e+00> : vector<64x32xf32>
    %102 = tpu.matmul %99, %101, %cst_52 {dimension_numbers = #tpu.dot_dimension_numbers<[1], [0], [0], [1], [0, 0, 1, 1], [], []>} : vector<64x8xf32>, vector<8x32xf32>, vector<64x32xf32> -> vector<64x32xf32>
    %103 = arith.addf %98, %102 : vector<64x32xf32>
    %c0_53 = arith.constant 0 : index
    %c0_54 = arith.constant 0 : index
    %104 = vector.load %arg8[%c0_53, %c0_54] : memref<64x32xf32, #tpu.memory_space<vmem>>, vector<64x32xf32>
    tpu.vector_store %arg8[%c0_53, %c0_54], %103 {strides = array<i32>} : memref<64x32xf32, #tpu.memory_space<vmem>>, vector<64x32xf32>,
    %105 = vector.extract_strided_slice %6 {offsets = [0, 24], sizes = [64, 8], strides = [1, 1]} : vector<64x96xf32> to vector<64x8xf32>
    %106 = vector.shape_cast %105 : vector<64x8xf32> to vector<4x16x8xf32>
    %107 = vector.extract_strided_slice %6 {offsets = [0, 56], sizes = [64, 8], strides = [1, 1]} : vector<64x96xf32> to vector<64x8xf32>
    %108 = vector.shape_cast %107 : vector<64x8xf32> to vector<4x16x8xf32>
    %109 = vector.extract_strided_slice %6 {offsets = [0, 88], sizes = [64, 8], strides = [1, 1]} : vector<64x96xf32> to vector<64x8xf32>
    %110 = vector.shape_cast %109 : vector<64x8xf32> to vector<4x16x8xf32>
    "tpu.trace_start"() <{level = 10 : i32, message = "bnd,bmd->bnm"}> : () -> ()
    %cst_55 = arith.constant dense<0.000000e+00> : vector<4x16x16xf32>
    %111 = tpu.matmul %106, %108, %cst_55 {dimension_numbers = #tpu.dot_dimension_numbers<[2], [2], [1], [1], [0, 0, 0, 1, 1, 1], [0], [0]>} : vector<4x16x8xf32>, vector<4x16x8xf32>, vector<4x16x16xf32> -> vector<4x16x16xf32>
    "tpu.trace_stop"() : () -> ()
    %c3 = arith.constant 3 : index
    %c0_56 = arith.constant 0 : index
    %c0_57 = arith.constant 0 : index
    %c0_58 = arith.constant 0 : index
    %112 = vector.load %arg6[%c3, %c0_56, %c0_57, %c0_58] : memref<4x1x16x16xf32, #tpu.memory_space<vmem>>, vector<1x1x16x16xf32>
    %113 = vector.shape_cast %112 : vector<1x1x16x16xf32> to vector<1x16x16xf32>
    %114 = vector.shape_cast %111 : vector<4x16x16xf32> to vector<4x1x16x16xf32>
    %115 = vector.shape_cast %113 : vector<1x16x16xf32> to vector<1x1x16x16xf32>
    %116 = vector.broadcast %115 : vector<1x1x16x16xf32> to vector<4x1x16x16xf32>
    %117 = arith.addf %114, %116 : vector<4x1x16x16xf32>
    %118 = vector.shape_cast %117 : vector<4x1x16x16xf32> to vector<4x16x16xf32>
    %cst_59 = arith.constant dense<0xFF800000> : vector<4x16xf32>
    %119 = vector.multi_reduction <maximumf>, %118, %cst_59 [2] : vector<4x16x16xf32> to vector<4x16xf32>
    %120 = vector.shape_cast %119 : vector<4x16xf32> to vector<4x16x1xf32>
    %121 = vector.broadcast %120 : vector<4x16x1xf32> to vector<4x16x16xf32>
    %122 = arith.subf %118, %121 : vector<4x16x16xf32>
    %123 = math.exp %122 : vector<4x16x16xf32>
    %cst_60 = arith.constant dense<0.000000e+00> : vector<4x16xf32>
    %124 = vector.multi_reduction <add>, %123, %cst_60 [2] : vector<4x16x16xf32> to vector<4x16xf32>
    %125 = vector.shape_cast %124 : vector<4x16xf32> to vector<4x16x1xf32>
    "tpu.trace_start"() <{level = 10 : i32, message = "bnm,bmd->bnd"}> : () -> ()
    %cst_61 = arith.constant dense<0.000000e+00> : vector<4x16x8xf32>
    %126 = tpu.matmul %123, %110, %cst_61 {dimension_numbers = #tpu.dot_dimension_numbers<[2], [1], [1], [2], [0, 0, 0, 1, 1, 2], [0], [0]>} : vector<4x16x16xf32>, vector<4x16x8xf32>, vector<4x16x8xf32> -> vector<4x16x8xf32>
    "tpu.trace_stop"() : () -> ()
    %127 = tpu.reciprocal %125 : vector<4x16x1xf32> -> vector<4x16x1xf32>
    %128 = vector.broadcast %127 : vector<4x16x1xf32> to vector<4x16x8xf32>
    %129 = arith.mulf %126, %128 : vector<4x16x8xf32>
    %c0_62 = arith.constant 0 : index
    %c0_63 = arith.constant 0 : index
    %130 = vector.load %arg8[%c0_62, %c0_63] : memref<64x32xf32, #tpu.memory_space<vmem>>, vector<64x32xf32>
    %131 = vector.shape_cast %129 : vector<4x16x8xf32> to vector<64x8xf32>
    %c3_64 = arith.constant 3 : index
    %c0_65 = arith.constant 0 : index
    %c0_66 = arith.constant 0 : index
    %132 = vector.load %arg4[%c3_64, %c0_65, %c0_66] : memref<4x8x32xf32, #tpu.memory_space<vmem>>, vector<1x8x32xf32>
    %133 = vector.shape_cast %132 : vector<1x8x32xf32> to vector<8x32xf32>
    %cst_67 = arith.constant dense<0.000000e+00> : vector<64x32xf32>
    %134 = tpu.matmul %131, %133, %cst_67 {dimension_numbers = #tpu.dot_dimension_numbers<[1], [0], [0], [1], [0, 0, 1, 1], [], []>} : vector<64x8xf32>, vector<8x32xf32>, vector<64x32xf32> -> vector<64x32xf32>
    %135 = arith.addf %130, %134 : vector<64x32xf32>
    %c0_68 = arith.constant 0 : index
    %c0_69 = arith.constant 0 : index
    %136 = vector.load %arg8[%c0_68, %c0_69] : memref<64x32xf32, #tpu.memory_space<vmem>>, vector<64x32xf32>
    tpu.vector_store %arg8[%c0_68, %c0_69], %135 {strides = array<i32>} : memref<64x32xf32, #tpu.memory_space<vmem>>, vector<64x32xf32>,
    %c0_70 = arith.constant 0 : index
    %c0_71 = arith.constant 0 : index
    %137 = vector.load %arg8[%c0_70, %c0_71] : memref<64x32xf32, #tpu.memory_space<vmem>>, vector<64x32xf32>
    %c0_72 = arith.constant 0 : index
    %c0_73 = arith.constant 0 : index
    %138 = vector.load %arg5[%c0_72, %c0_73] : memref<1x32xf32, #tpu.memory_space<vmem>>, vector<1x32xf32>
    %139 = vector.broadcast %138 : vector<1x32xf32> to vector<64x32xf32>
    %140 = arith.addf %137, %139 : vector<64x32xf32>
    %141 = vector.shape_cast %140 : vector<64x32xf32> to vector<4x16x32xf32>
    %c0_74 = arith.constant 0 : index
    %c0_75 = arith.constant 0 : index
    %c0_76 = arith.constant 0 : index
    %142 = vector.load %arg7[%c0_74, %c0_75, %c0_76] : memref<4x16x32xf32, #tpu.memory_space<vmem>>, vector<4x16x32xf32>
    tpu.vector_store %arg7[%c0_74, %c0_75, %c0_76], %141 {strides = array<i32>} : memref<4x16x32xf32, #tpu.memory_space<vmem>>, vector<4x16x32xf32>,
    return
  }
  func.func @transform_0(%arg0: i32) -> (i32, i32, i32) {
    %c0_i32 = arith.constant 0 : i32
    %c0_i32_0 = arith.constant 0 : i32
    %c0_i32_1 = arith.constant 0 : i32
    return %arg0, %c0_i32, %c0_i32_0 : i32, i32, i32
  }
  func.func @transform_1(%arg0: i32) -> (i32, i32) {
    %c0_i32 = arith.constant 0 : i32
    %c0_i32_0 = arith.constant 0 : i32
    %c0_i32_1 = arith.constant 0 : i32
    return %c0_i32, %c0_i32_0 : i32, i32
  }
  func.func @transform_2(%arg0: i32) -> (i32, i32) {
    %c0_i32 = arith.constant 0 : i32
    %c0_i32_0 = arith.constant 0 : i32
    %c0_i32_1 = arith.constant 0 : i32
    return %c0_i32, %c0_i32_0 : i32, i32
  }
  func.func @transform_3(%arg0: i32) -> (i32, i32, i32) {
    %c0_i32 = arith.constant 0 : i32
    %c0_i32_0 = arith.constant 0 : i32
    %c0_i32_1 = arith.constant 0 : i32
    %c0_i32_2 = arith.constant 0 : i32
    return %c0_i32, %c0_i32_0, %c0_i32_1 : i32, i32, i32
  }
  func.func @transform_4(%arg0: i32) -> (i32, i32) {
    %c0_i32 = arith.constant 0 : i32
    %c0_i32_0 = arith.constant 0 : i32
    %c0_i32_1 = arith.constant 0 : i32
    return %c0_i32, %c0_i32_0 : i32, i32
  }
  func.func @transform_5(%arg0: i32) -> (i32, i32, i32, i32) {
    %c0_i32 = arith.constant 0 : i32
    %c0_i32_0 = arith.constant 0 : i32
    %c0_i32_1 = arith.constant 0 : i32
    %c0_i32_2 = arith.constant 0 : i32
    %c0_i32_3 = arith.constant 0 : i32
    return %c0_i32, %c0_i32_0, %c0_i32_1, %c0_i32_2 : i32, i32, i32, i32
  }
  func.func @transform_6(%arg0: i32) -> (i32, i32, i32) {
    %c0_i32 = arith.constant 0 : i32
    %c0_i32_0 = arith.constant 0 : i32
    %c0_i32_1 = arith.constant 0 : i32
    return %arg0, %c0_i32, %c0_i32_0 : i32, i32, i32
  }
}

</mosaic_0001>

<bundles_post_ra>
// kernel: tpu_custom_call.1
= control target key start
LH: loop header
LB: loop body
LE: loop exit
PB: predicated region body
PF: predicated region fallthrough
CT: control target
= control target key end

     0   :  { %11 = vsyncpa [#allocation4], 0  ;;  %s6721_s0 = inlined_call_operand.hbm [shape: f32[8,16,32], index: 0, kind: input, shape index: {}]   ;;  %s6722_s1 = inlined_call_operand.hbm [shape: f32[32,96], index: 1, kind: input, shape index: {}]   ;;  %s6723_s2 = inlined_call_operand.vmem [shape: f32[1,96], index: 2, kind: input, shape index: {}]   ;;  %s6724_s3 = inlined_call_operand.hbm [shape: f32[4,8,32], index: 3, kind: input, shape index: {}]   ;;  %s6725_s4 = inlined_call_operand.vmem [shape: f32[1,32], index: 4, kind: input, shape index: {}]   ;;  %s6726_s5 = inlined_call_operand.hbm [shape: f32[4,1,16,16], index: 5, kind: input, shape index: {}]   ;;  %s6727_s6 = inlined_call_operand.hbm [shape: f32[8,16,32], index: 6, kind: output, shape index: {}]  }
   0x1   :  { %13 = vsyncpa [#allocation4 + $0x1], 0 }
   0x2   :  { %14 = vsyncpa [#allocation7], 0 }
   0x3   :  { %15 = vsyncpa [#allocation10], 0 }
   0x4   :  { %16 = vsyncpa [#allocation5], 0 }
   0x5   :  { %18 = vsyncpa [#allocation5 + $0x1], 0  ;;  %s5915_s21 = smov 0   ;;  %s5917_s22 = smov 0  }
   0x6   :  { %s5919_s23 = smov 0   ;;  %s5921_s24 = smov 0  }
   0x7 LB: > { %s5936_s25 = sadd.s32 4294967295, %s5857_s24   ;;  %s4478_s26 = sadd.s32 4294967294, %s5857_s24   ;;  %s5857_s24 = sphi %s5921_s24, %s6752_s24   ;;  %s5853_s23 = sphi %s5919_s23, %s6751_s23   ;;  %s5849_s22 = sphi %s5917_s22, %s6750_s22   ;;  %s5845_s21 = sphi %s5915_s21, %s6749_s21  }
   0x8   : > { %p44_p0 = scmp.ne.s32.totalorder %s5849_s22, %s5845_s21  ;;  %p6728_p1 = scmp.eq.s32.totalorder %s5936_s25, 0 }
   0x9   : > { %p179_p3 = scmp.eq.s32.totalorder %s4478_s26, 1  ;;  %p4479_p5 = scmp.ge.s32.totalorder %s5857_s24, 1 }
   0xa   : > { %p5945_p4 = por %p6728_p1, %p44_p0  ;;  %p186_p7 = scmp.lt.s32.totalorder %s5857_s24, 3 }
   0xb   : > { %p5950_p6 = por %p179_p3, %p44_p0  ;;  %s5859_s30 = smov [#allocation6]  }
   0xc   : > { %s6731_s27 = scalar_select %p5945_p4, 1, 0 }
   0xd   : > { %s6732_s28 = scalar_select %p5950_p6, 1, 0 }
   0xe   : > { %p5955_p8 = pnand %p4479_p5, %p186_p7  ;;  %s198_s7 = sshll.u32 %s5859_s30, 4  ;;  %s5959_s7 = int_to_ptr.vmem [resolvable:$true] %s198_s7 }
   0xf   : > { %s5860_s9 = smov [#allocation8]   ;;  %s5861_s11 = smov [#allocation9]  }
  0x10   : > { %s6733_s29 = scalar_select %p5955_p8, 1, 0 }
  0x11   : > { %p5304_p9 = pneg %p5955_p8  ;;  %s214_s10 = sshll.u32 %s5860_s9, 4  ;;  %s5970_s10 = int_to_ptr.vmem [resolvable:$true] %s214_s10 }
  0x12   : > { %s5972_s12 = sshll.u32 %s5861_s11, 4  ;;  %s5669_s15 = scalar_lea.hbm %s6722_s1, 512  ;;  %s231_s12 = int_to_ptr.vmem [resolvable:$true] %s5972_s12 }
  0x13   : > { %p5966_p11 = pnand %p5304_p9, %p6728_p1  ;;  %p5670_p12 = scmp.ne.s32.totalorder %s6722_s1, %s5669_s15 }
  0x14   : > { %p5676_p5 = scmp.lt.u32.totalorder %s5669_s15, %s6722_s1 }
  0x15   : > { %p5982_p13 = pneg %p5966_p11 }
  0x17   : > { %p5672_p0 = pnand %p5982_p13, %p5670_p12 }
  0x19   : > { %p5673_p3 = pneg %p5672_p0 }
  0x1b   : > { %p5678_p7 = pnand %p5676_p5, %p5673_p3 }
  0x1d   : > { %5681 = shalt.err (!%p5678_p7)
}
  0x1e   : > { %s5682_s26 = scalar_lea.vmem %s5959_s7, 512  ;;  %p5690_p2 = scmp.lt.s32.totalorder %s5959_s7, %s5959_s7 }
  0x1f   : > { %p5683_p9 = scmp.ne.s32.totalorder %s5959_s7, %s5682_s26  ;;  %p5691_p6 = scmp.lt.s32.totalorder %s5682_s26, %s5682_s26 }
  0x21   : > { %p5685_p10 = pnand %p5683_p9, %p5982_p13  ;;  %p5692_p12 = por %p5691_p6, %p5690_p2 }
  0x23   : > { %p5686_p1 = pneg %p5685_p10 }
  0x25   : > { %p5693_p0 = pnand %p5692_p12, %p5686_p1 }
  0x27   : > { %5696 = shalt.err (!%p5693_p0)
}
  0x28   : > { %s5862_s30 = smov 128   ;;  %s5863_s9 = smov 8  }
  0x29   : > { %5307 = dma.hbm_to_vmem [thread:$0]  (!%p5966_p11), %s6722_s1, 512, %s5959_s7, [#allocation7], %s5862_s30, %s5862_s30, %s5863_s9  }
  0x2a   : > { %s5697_s16 = scalar_lea.hbm %s6724_s3, 512 }
  0x2b   : > { %p5698_p1 = scmp.ne.s32.totalorder %s6724_s3, %s5697_s16  ;;  %p5704_p10 = scmp.lt.u32.totalorder %s5697_s16, %s6724_s3 }
  0x2d   : > { %p5700_p2 = pnand %p5698_p1, %p5982_p13 }
  0x2f   : > { %p5701_p6 = pneg %p5700_p2 }
  0x31   : > { %p5706_p3 = pnand %p5704_p10, %p5701_p6 }
  0x33   : > { %5709 = shalt.err (!%p5706_p3)
}
  0x34   : > { %s5710_s7 = scalar_lea.vmem %s5970_s10, 512  ;;  %p5718_p12 = scmp.lt.s32.totalorder %s5970_s10, %s5970_s10 }
  0x35   : > { %p5711_p5 = scmp.ne.s32.totalorder %s5970_s10, %s5710_s7  ;;  %p5719_p0 = scmp.lt.s32.totalorder %s5710_s7, %s5710_s7 }
  0x37   : > { %p5713_p7 = pnand %p5711_p5, %p5982_p13  ;;  %p5720_p1 = por %p5719_p0, %p5718_p12 }
  0x39   : > { %p5714_p9 = pneg %p5713_p7 }
  0x3b   : > { %p5721_p2 = pnand %p5720_p1, %p5714_p9 }
  0x3d   : > { %5724 = shalt.err (!%p5721_p2)
}
  0x3e   : > { %5310 = dma.hbm_to_vmem [thread:$0]  (!%p5966_p11), %s6724_s3, 512, %s5970_s10, [#allocation7], %s5862_s30, %s5862_s30, %s5863_s9  }
  0x3f   : > { %s5725_s16 = scalar_lea.hbm %s6726_s5, 1024 }
  0x40   : > { %p5726_p6 = scmp.ne.s32.totalorder %s6726_s5, %s5725_s16  ;;  %p5732_p5 = scmp.lt.u32.totalorder %s5725_s16, %s6726_s5 }
  0x42   : > { %p5728_p10 = pnand %p5726_p6, %p5982_p13 }
  0x44   : > { %p5729_p3 = pneg %p5728_p10 }
  0x46   : > { %p5734_p7 = pnand %p5732_p5, %p5729_p3 }
  0x48   : > { %5737 = shalt.err (!%p5734_p7)
}
  0x49   : > { %s5738_s7 = scalar_lea.vmem %s231_s12, 1024  ;;  %p5746_p1 = scmp.lt.s32.totalorder %s231_s12, %s231_s12 }
  0x4a   : > { %p5739_p9 = scmp.ne.s32.totalorder %s231_s12, %s5738_s7  ;;  %p5747_p2 = scmp.lt.s32.totalorder %s5738_s7, %s5738_s7 }
  0x4c   : > { %p5741_p12 = pnand %p5739_p9, %p5982_p13  ;;  %p5748_p4 = por %p5747_p2, %p5746_p1 }
  0x4e   : > { %p5742_p0 = pneg %p5741_p12 }
  0x50   : > { %p5749_p8 = pnand %p5748_p4, %p5742_p0 }
  0x52   : > { %5752 = shalt.err (!%p5749_p8)
}
  0x53   : > { %5313 = dma.hbm_to_vmem [thread:$0]  (!%p5966_p11), %s6726_s5, 1024, %s231_s12, [#allocation10], %s5862_s30, %s5862_s30, %s5863_s9  }
  0x54   : > { %s6055_s18 = sadd.s32 1, %s5857_s24   ;;  %s31_s13 = sadd.s32 1, %s5853_s23 }
  0x55   : > { %s28_s8 = ssub.s32 %s5857_s24, %s6055_s18  ;;  %p38_p8 = scmp.ne.s32.totalorder %s5853_s23, %s5849_s22 }
  0x56   : > { %p29_p4 = scmp.eq.s32.totalorder %s28_s8, 0  ;;  %p39_p13 = scmp.eq.s32.totalorder %s5857_s24, 0 }
  0x57   : > { %p5325_p6 = scmp.lt.s32.totalorder %s5857_s24, 2  ;;  %p6736_p3 = scmp.eq.s32.totalorder %s5936_s25, 1 }
  0x58   : > { %s6065_s14 = scalar_select %p29_p4, %s5853_s23, %s31_s13  }
  0x59   : > { %p40_p10 = por %p39_p13, %p38_p8  ;;  %p6069_p5 = por %p6736_p3, %p38_p8 }
  0x5a   : > { %s244_s16 = sand.u32 1, %s5853_s23   ;;  %s4639_s17 = sshll.u32 %s5857_s24, 10 }
  0x5b   : > { %s4484_s12 = sshll.u32 %s244_s16, 6  ;;  %s6078_s26 = scalar_lea.hbm %s6721_s0, %s4639_s17 }
  0x5c   : > { %s248_s7 = scalar_lea.vmem [#allocation3], %s4484_s12  ;;  %p6080_p11 = pnand %p5325_p6, %p40_p10 }
  0x5d   : > { %s256_s10 = sshll.u32 %s248_s7, 4  ;;  %s6086_s8 = scalar_lea.sflag [#allocation4], %s244_s16  ;;  %s6084_s10 = int_to_ptr.vmem [resolvable:$true] %s256_s10 }
  0x5e   : > { %s5753_s13 = scalar_lea.hbm %s6078_s26, 1024  ;;  %p5755_p9 = pneg %p6080_p11 }
  0x5f   : > { %p5754_p7 = scmp.ne.s32.totalorder %s6078_s26, %s5753_s13  ;;  %s5758_s19 = scalar_lea.hbm %s6721_s0, 2048 }
  0x60   : > { %p5759_p1 = scmp.lt.u32.totalorder %s6078_s26, %s6721_s0  ;;  %p5760_p2 = scmp.lt.u32.totalorder %s5758_s19, %s5753_s13 }
  0x61   : > { %p5756_p12 = pnand %p5755_p9, %p5754_p7  ;;  %p5762_p8 = scmp.lt.u32.totalorder %s5753_s13, %s6078_s26 }
  0x62   : > { %p5761_p4 = por %p5760_p2, %p5759_p1 }
  0x63   : > { %p5757_p0 = pneg %p5756_p12 }
  0x64   : > { %p5763_p13 = por %p5762_p8, %p5761_p4 }
  0x66   : > { %p5764_p6 = pnand %p5763_p13, %p5757_p0 }
  0x68   : > { %5767 = shalt.err (!%p5764_p6)
}
  0x69   : > { %s5768_s16 = scalar_lea.vmem %s6084_s10, 1024  ;;  %s5864_s17 = smov [#allocation3]  }
  0x6a   : > { %p5769_p10 = scmp.ne.s32.totalorder %s6084_s10, %s5768_s16  ;;  %s5773_s12 = sshll.u32 %s5864_s17, 4  ;;  %s5774_s12 = int_to_ptr.vmem [resolvable:$false] %s5773_s12 }
  0x6b   : > { %s5775_s20 = scalar_lea.vmem %s5774_s12, 2048  ;;  %p5776_p12 = scmp.lt.s32.totalorder %s6084_s10, %s5774_s12 }
  0x6c   : > { %p5771_p3 = pnand %p5769_p10, %p5755_p9  ;;  %p5777_p1 = scmp.lt.s32.totalorder %s5775_s20, %s5768_s16 }
  0x6e   : > { %p5772_p7 = pneg %p5771_p3  ;;  %p5778_p2 = por %p5777_p1, %p5776_p12 }
  0x70   : > { %p5779_p4 = pnand %p5778_p2, %p5772_p7 }
  0x72   : > { %5782 = shalt.err (!%p5779_p4)
}
  0x73   : > { %5317 = dma.hbm_to_vmem [thread:$0]  (!%p6080_p11), %s6078_s26, 1024, %s6084_s10, %s6086_s8, %s5862_s30, %s5862_s30, %s5863_s9  }
  0x74   : > { %p6739_p9 = scmp.ne.s32.totalorder %s6733_s29, 0 }
  0x75   : > { %s6120_s13 = sand.u32 (!%p6739_p9), 1, %s5849_s22   ;;  %p6740_p0 = scmp.ne.s32.totalorder (!%p6739_p9), %s6731_s27, 0 }
  0x76   : > { %268 = sbr.rel (%p6739_p9) target bundleno = 3234 (0xca2), region = 44  ;;  %s4489_s19 = sshll.u32 (!%p6739_p9), %s6120_s13, 6 }
  0x77   : > { %s271_s7 = scalar_lea.sflag (!%p6739_p9), [#allocation4], %s6120_s13  ;;  %s6126_s11 = scalar_lea.vmem (!%p6739_p9), [#allocation3], %s4489_s19 }
  0x7d   : > { %5828 = dma.done.wait (%p6740_p0), %s271_s7, 1024  }
  0x7e   : > { %5830 = vsyncadd (%p6740_p0), %s271_s7, 4294966272  ;;  %p6741_p11 = scmp.eq.s32.totalorder %s5936_s25, 0 }
  0x80   : > { %5832 = dma.done.wait (%p6741_p11), [#allocation7], 1024   ;;  %p6742_p8 = pmov %p6741_p11 }
  0x82   : > { %5834 = vsyncadd (%p6742_p8), [#allocation7], 4294966272  ;;  %p6743_p13 = pmov %p6742_p8 }
  0x83   : > { %p6744_p6 = pmov %p6742_p8 }
  0x84   : > { %5836 = dma.done.wait (%p6743_p13), [#allocation10], 1024  }
  0x85   : > { %5838 = vsyncadd (%p6744_p6), [#allocation10], 4294966272  ;;  %vm336_vm0 = vcmask 261120   ;;  %v325_v0 = vld [vmem:[#allocation6] sm:$0xff]  ;;  %v326_v1 = vld [vmem:[#allocation6 + $0x8] sm:$0xff]  ;;  %vm480_vm1 = vcmask 64512  }
  0x86   : > { %v327_v2 = vld [vmem:[#allocation6 + $0x10] sm:$0xff]  ;;  %v5118_v3 = vpack.c.bf16 %v326_v1, %v325_v0  ;;  %v328_v4 = vld [vmem:[#allocation6 + $0x18] sm:$0xff]  ;;  %v317_v5 = vld [vmem:[%s6126_s11] sm:$0xff]  ;;  %s5865_s30 = smov 96   ;;  %s5866_s9 = smov 64   ;;  %vm841_vm3 = vcmask 130048  }
  0x87   : > { %v5122_v6 = vpack.c.bf16 %v328_v4, %v327_v2  ;;  %4826 = vmatprep.mubr.msk.f32.mxu0 %vm336_vm0, %v317_v5  ;;  %v318_v7 = vld [vmem:[%s6126_s11 + $0x8] sm:$0xff]  ;;  %v319_v8 = vld [vmem:[%s6126_s11 + $0x10] sm:$0xff]  ;;  %v320_v9 = vld [vmem:[%s6126_s11 + $0x18] sm:$0xff]  ;;  %s5867_s26 = smov 88   ;;  %s5868_s10 = smov 120  }
  0x88   : > { %5119 = vmatprep.subr.bf16.mxu0 %v5118_v3  ;;  %v321_v10 = vld [vmem:[%s6126_s11 + $0x20] sm:$0xff]  ;;  %v322_v11 = vld [vmem:[%s6126_s11 + $0x28] sm:$0xff]  ;;  %v323_v12 = vld [vmem:[%s6126_s11 + $0x30] sm:$0xff]  ;;  %s5869_s8 = smov 56   ;;  %s5871_s16 = smov 80  }
  0x89   : > { %5121 = vmatpush3.bf16.msra.mxu0 %v5118_v3  ;;  %v324_v13 = vld [vmem:[%s6126_s11 + $0x38] sm:$0xff]  ;;  %v4494_v14 = vld [vmem:[%s6723_s2] ss:$0 sm:$0xff]  ;;  %vm6203_vm2 = vmpackc.low %vm480_vm1, %vm480_vm1  ;;  %s5872_s17 = smov 112   ;;  %s5873_s12 = smov 48  }
  0x8a   : > { %5123 = vmatprep.subr.bf16.mxu0 %v5122_v6  ;;  %v832_v56 = vld [vmem:[#allocation9 + $0x8] sm:$0xff]  ;;  %v831_v57 = vld [vmem:[#allocation9] sm:$0xff]  ;;  %s5874_s20 = smov 72   ;;  %s5875_s7 = smov 104  }
  0x8b   : > { %s5876_s11 = smov 40  }
  0x8d   : > { %5125 = vmatpush3.bf16.msra.mxu0 %v5122_v6 }
  0x90   : > { %4827 = vmatmul.mubr.msk.f32.vlgmr.msra.gmra.mrb[0].mxu0 %vm336_vm0, %v318_v7 }
  0x91   : > { %4829 = vmatprep.mubr.msk.f32.mxu0 %vm336_vm0, %v319_v8 }
  0x94   : > { %4830 = vmatmul.mubr.msk.f32.gmra.mrb[2].mxu0 %vm336_vm0, %v320_v9 }
  0x95   : > { %4832 = vmatprep.mubr.msk.f32.mxu0 %vm336_vm0, %v321_v10 }
  0x98   : > { %4833 = vmatmul.mubr.msk.f32.gmra.mrb[4].mxu0 %vm336_vm0, %v322_v11 }
  0x99   : > { %4835 = vmatprep.mubr.msk.f32.mxu0 %vm336_vm0, %v323_v12 }
  0x9c   : > { %4836 = vmatmul.mubr.msk.f32.gmra.mrb[6].mxu0 %vm336_vm0, %v324_v13 }
 0x163   : > { %v4828_v15 = vpop.f32.mrb[0].mxu0 }
 0x164   : > { %v6159_v16 = vadd.f32 %v4828_v15, %v4494_v14  ;;  %v427_v17 = vpop.f32.mrb[1].mxu0 }
 0x165   : > { %v6161_v18 = vadd.f32 %v4494_v14, %v427_v17 }
 0x167   : > { %v4831_v19 = vpop.f32.mrb[2].mxu0  ;;  %4842 = vmatprep.mubr.msk.f32.mxu1 %vm480_vm1, %v6161_v18  ;;  %v6167_v20 = vpack.i.bf16 %v6159_v16, %v6161_v18 }
 0x168   : > { %v6169_v21 = vadd.f32 %v4831_v19, %v4494_v14  ;;  %v437_v22 = vpop.f32.mrb[3].mxu0 }
 0x169   : > { %v6171_v23 = vadd.f32 %v4494_v14, %v437_v22  ;;  %5382 = vrot.lane.b32.xlu0 %v6167_v20, %s5865_s30 }
 0x16b   : > { %v4834_v24 = vpop.f32.mrb[4].mxu0  ;;  %v6176_v25 = vpack.i.bf16 %v6169_v21, %v6171_v23 }
 0x16c   : > { %v6178_v26 = vadd.f32 %v4834_v24, %v4494_v14  ;;  %v447_v27 = vpop.f32.mrb[5].mxu0 }
 0x16d   : > { %v6180_v28 = vadd.f32 %v4494_v14, %v447_v27  ;;  %5387 = vrot.lane.b32.xlu0 %v6176_v25, %s5865_s30 }
 0x16f   : > { %v4837_v29 = vpop.f32.mrb[6].mxu0  ;;  %4856 = vmatprep.mubr.msk.f32.mxu0 %vm480_vm1, %v6180_v28  ;;  %v6187_v30 = vpack.i.bf16 %v6178_v26, %v6180_v28 }
 0x170   : > { %v6189_v31 = vadd.f32 %v4837_v29, %v4494_v14  ;;  %v457_v32 = vpop.f32.mrb[7].mxu0 }
 0x171   : > { %v6191_v33 = vadd.f32 %v4494_v14, %v457_v32  ;;  %5392 = vrot.lane.b32.xlu1 %v6187_v30, %s5865_s30 }
 0x173   : > { %v6196_v34 = vpack.i.bf16 %v6189_v31, %v6191_v33 }
 0x175   : > { %5397 = vrot.lane.b32.xlu1 %v6196_v34, %s5865_s30  ;;  %s6646_s30 = scalar_lea.vmem [#allocation11], %s4489_s19  ;;  %s4641_s19 = sshll.u32 %s5936_s25, 10 }
 0x176   : > { %s4362_s25 = scalar_lea.sflag [#allocation5], %s6120_s13 }
 0x179   : > { %5402 = vrot.lane.b32.xlu1 %v6167_v20, %s5866_s9 }
 0x1db   : > { %v5383_v35 = vpop.permute.xlu0 %5382 }
 0x1dc   : > { %v5385_v36 = vunpack.i.h.bf16 %v5383_v35  ;;  %v5384_v37 = vunpack.i.l.bf16 %v5383_v35 }
 0x1de   : > { %v5126_v39 = vpack.c.bf16 %v5385_v36, %v5384_v37 }
 0x1df   : > { %v5388_v40 = vpop.permute.xlu0 %5387 }
 0x1e0   : > { %v5390_v41 = vunpack.i.h.bf16 %v5388_v40  ;;  %v5389_v42 = vunpack.i.l.bf16 %v5388_v40  ;;  %5128 = vmatprep.subr.msk.bf16.mxu1 %vm6203_vm2, %v5126_v39 }
 0x1e1   : > { %5131 = vmatpush3.bf16.xpose.msk.msra.mxu1 %vm6203_vm2, %v5126_v39 }
 0x1e2   : > { %v5132_v43 = vpack.c.bf16 %v5390_v41, %v5389_v42 }
 0x1e3   : > { %v5393_v44 = vpop.permute.xlu1 %5392 }
 0x1e4   : > { %v5395_v45 = vunpack.i.h.bf16 %v5393_v44  ;;  %v5394_v46 = vunpack.i.l.bf16 %v5393_v44  ;;  %5134 = vmatprep.subr.msk.bf16.mxu1 %vm6203_vm2, %v5132_v43 }
 0x1e6   : > { %v5138_v47 = vpack.c.bf16 %v5395_v45, %v5394_v46 }
 0x1e7   : > { %v5398_v48 = vpop.permute.xlu1 %5397 }
 0x1e8   : > { %v5400_v49 = vunpack.i.h.bf16 %v5398_v48  ;;  %v5399_v50 = vunpack.i.l.bf16 %v5398_v48  ;;  %4843 = vmatmul.mubr.msk.f32.vlgmr.msra.gmra.mrb[0].mxu1 %vm480_vm1, %v6159_v16  ;;  %5140 = vmatprep.subr.msk.bf16.mxu0 %vm6203_vm2, %v5138_v47 }
 0x1e9   : > { %5137 = vmatpush3.bf16.xpose.msk.msra.mxu1 %vm6203_vm2, %v5132_v43  ;;  %4849 = vmatprep.mubr.msk.f32.mxu1 %vm480_vm1, %v6171_v23 }
 0x1ea   : > { %v5144_v51 = vpack.c.bf16 %v5400_v49, %v5399_v50  ;;  %5143 = vmatpush3.bf16.xpose.msk.msra.mxu0 %vm6203_vm2, %v5138_v47 }
 0x1eb   : > { %v5403_v52 = vpop.permute.xlu1 %5402 }
 0x1ec   : > { %v5405_v53 = vunpack.i.h.bf16 %v5403_v52  ;;  %v5404_v54 = vunpack.i.l.bf16 %v5403_v52  ;;  %5146 = vmatprep.subr.msk.bf16.mxu1 %vm6203_vm2, %v5144_v51 }
 0x1ee   : > { %v5150_v55 = vpack.c.bf16 %v5405_v53, %v5404_v54 }
 0x1f0   : > { %4850 = vmatmul.mubr.msk.f32.vlgmr.msra.gmra.mrb[2].mxu1 %vm480_vm1, %v6169_v21  ;;  %5151 = vmatprep.subr.bf16.mxu0 %v5150_v55 }
 0x1f1   : > { %4857 = vmatmul.mubr.msk.f32.vlgmr.msra.gmra.mrb[8].mxu0 %vm480_vm1, %v6178_v26  ;;  %5149 = vmatpush3.bf16.xpose.msk.msra.mxu1 %vm6203_vm2, %v5144_v51 }
 0x1f2   : > { %4863 = vmatprep.mubr.msk.f32.mxu1 %vm480_vm1, %v6191_v33  ;;  %5153 = vmatpush3.bf16.msra.mxu0 %v5150_v55 }
 0x1f8   : > { %4864 = vmatmul.mubr.msk.f32.vlgmr.msra.gmra.mrb[4].mxu1 %vm480_vm1, %v6189_v31 }
 0x2bb   : > { %v4844_v58 = vpop.f32.mrb[0].mxu1 }
 0x2bc   : > { %v834_v59 = vadd.f32 %v4844_v58, %v832_v56  ;;  %v555_v60 = vpop.f32.mrb[1].mxu1 }
 0x2bd   : > { %v833_v61 = vadd.f32 %v831_v57, %v555_v60 }
 0x2be   : > { %v845_v62 = vsel %vm841_vm3, %v834_v59, -inf }
 0x2bf   : > { %846 = vmax.xlane.f32.xlu1 %v845_v62  ;;  %v842_v63 = vsel %vm841_vm3, %v833_v61, -inf }
 0x2c0   : > { %843 = vmax.xlane.f32.xlu0 %v842_v63 }
 0x2c3   : > { %v4851_v0 = vpop.f32.mrb[2].mxu1 }
 0x2c4   : > { %v836_v1 = vadd.f32 %v4851_v0, %v832_v56  ;;  %v4858_v2 = vpop.f32.mrb[8].mxu0  ;;  %v644_v3 = vpop.f32.mrb[3].mxu1 }
 0x2c5   : > { %v733_v4 = vpop.f32.mrb[9].mxu0  ;;  %v838_v5 = vadd.f32 %v4858_v2, %v832_v56  ;;  %v835_v9 = vadd.f32 %v831_v57, %v644_v3 }
 0x2c6   : > { %v837_v6 = vadd.f32 %v831_v57, %v733_v4  ;;  %v851_v7 = vsel %vm841_vm3, %v836_v1, -inf }
 0x2c7   : > { %852 = vmax.xlane.f32.xlu0 %v851_v7  ;;  %v857_v10 = vsel %vm841_vm3, %v838_v5, -inf  ;;  %v848_v14 = vsel %vm841_vm3, %v835_v9, -inf }
 0x2c8   : > { %v854_v8 = vsel %vm841_vm3, %v837_v6, -inf }
 0x2c9   : > { %855 = vmax.xlane.f32.xlu1 %v854_v8 }
 0x2cb   : > { %858 = vmax.xlane.f32.xlu0 %v857_v10  ;;  %v4865_v11 = vpop.f32.mrb[4].mxu1 }
 0x2cc   : > { %v822_v12 = vpop.f32.mrb[5].mxu1  ;;  %v6240_v13 = vadd.f32 %v4865_v11, %v832_v56  ;;  %v1286_v56 = vld [vmem:[#allocation8] sm:$0xff] }
 0x2cd   : > { %v6253_v17 = vadd.f32 %v831_v57, %v822_v12 }
 0x2ce   : > { %v863_v15 = vsel %vm841_vm3, %v6240_v13, -inf }
 0x2cf   : > { %849 = vmax.xlane.f32.xlu0 %v848_v14  ;;  %v860_v19 = vsel %vm841_vm3, %v6253_v17, -inf }
 0x2d3   : > { %864 = vmax.xlane.f32.xlu0 %v863_v15 }
 0x2da   : > { %5412 = vrot.lane.b32.xlu1 %v6187_v30, %s5866_s9 }
 0x2e9   : > { %5407 = vrot.lane.b32.xlu0 %v6176_v25, %s5866_s9 }
 0x2ed   : > { %5427 = vrot.lane.b32.xlu0 %v6176_v25, %s5867_s26 }
 0x2f1   : > { %5432 = vrot.lane.b32.xlu0 %v6187_v30, %s5867_s26 }
 0x2fe   : > { %861 = vmax.xlane.f32.xlu1 %v860_v19 }
 0x30f   : > { %5417 = vrot.lane.b32.xlu1 %v6196_v34, %s5866_s9  ;;  %s4376_s9 = sshll.u32 %s6646_s30, 4  ;;  %s6673_s9 = int_to_ptr.vmem [resolvable:$true] %s4376_s9 }
 0x313   : > { %5422 = vrot.lane.b32.xlu1 %v6167_v20, %s5867_s26 }
 0x317   : > { %1432 = vrot.lane.b32.xlu1 %v6161_v18, %s5868_s10 }
 0x31b   : > { %1434 = vrot.lane.b32.xlu1 %v6159_v16, %s5868_s10 }
 0x31f   : > { %1523 = vrot.lane.b32.xlu1 %v6171_v23, %s5868_s10 }
 0x34c   : > { %v847_v22 = vpop.xlane.xlu1 %846 }
 0x34d   : > { %v867_v24 = vsub.f32 %v834_v59, %v847_v22  ;;  %v844_v27 = vpop.xlane.xlu0 %843 }
 0x34e   : > { %v866_v29 = vsub.f32 %v833_v61, %v844_v27 }
 0x34f   : > { %v876_v32 = vmul.f32 1.442695, %v867_v24 }
 0x350   : > { %v874_v35 = vmul.f32 1.442695, %v866_v29 }
 0x351   : > { %5541 = vpow2.f32 %v876_v32 }
 0x352   : > { %5543 = vpow2.f32 %v874_v35 }
 0x354   : > { %v853_v36 = vpop.xlane.xlu0 %852 }
 0x355   : > { %v869_v37 = vsub.f32 %v836_v1, %v853_v36 }
 0x356   : > { %v856_v39 = vpop.xlane.xlu1 %855 }
 0x357   : > { %v880_v40 = vmul.f32 1.442695, %v869_v37  ;;  %v870_v41 = vsub.f32 %v837_v6, %v856_v39 }
 0x358   : > { %v859_v42 = vpop.xlane.xlu0 %858 }
 0x359   : > { %5545 = vpow2.f32 %v880_v40  ;;  %v882_v43 = vmul.f32 1.442695, %v870_v41  ;;  %v871_v44 = vsub.f32 %v838_v5, %v859_v42 }
 0x35a   : > { %v5413_v45 = vpop.permute.xlu1 %5412 }
 0x35b   : > { %v5542_v46 = vpop.eup %5541  ;;  %5547 = vpow2.f32 %v882_v43  ;;  %v884_v47 = vmul.f32 1.442695, %v871_v44  ;;  %v5415_v48 = vunpack.i.h.bf16 %v5413_v45  ;;  %v5414_v49 = vunpack.i.l.bf16 %v5413_v45 }
 0x35c   : > { %v5544_v50 = vpop.eup %5543  ;;  %v850_v51 = vpop.xlane.xlu0 %849  ;;  %v893_v52 = vsel %vm841_vm3, %v5542_v46, 0.0 }
 0x35d   : > { %5549 = vpow2.f32 %v884_v47  ;;  %v868_v53 = vsub.f32 %v835_v9, %v850_v51  ;;  %4870 = vmatprep.mubr.msk.f32.mxu0 %vm841_vm3, %v5544_v50  ;;  %894 = vadd.xlane.f32.xlu1 %v893_v52  ;;  %v5158_v54 = vpack.c.bf16 %v5415_v48, %v5414_v49  ;;  %v890_v55 = vsel %vm841_vm3, %v5544_v50, 0.0 }
 0x35e   : > { %4871 = vmatmul.mubr.msk.f32.vlgmr.msra.gmra.mrb[10].mxu0 %vm841_vm3, %v5542_v46  ;;  %891 = vadd.xlane.f32.xlu0 %v890_v55 }
 0x35f   : > { %v878_v57 = vmul.f32 1.442695, %v868_v53  ;;  %5159 = vmatprep.subr.bf16.mxu0 %v5158_v54 }
 0x360   : > { %5161 = vmatpush3.bf16.msra.mxu0 %v5158_v54  ;;  %v865_v58 = vpop.xlane.xlu0 %864 }
 0x361   : > { %5551 = vpow2.f32 %v878_v57  ;;  %4894 = vmatprep.subr.mxu0 %v1286_v56  ;;  %v873_v11 = vsub.f32 %v6240_v13, %v865_v58 }
 0x363   : > { %v5546_v59 = vpop.eup %5545  ;;  %v888_v15 = vmul.f32 1.442695, %v873_v11 }
 0x364   : > { %v5408_v60 = vpop.permute.xlu0 %5407  ;;  %v899_v61 = vsel %vm841_vm3, %v5546_v59, 0.0 }
 0x365   : > { %v5548_v62 = vpop.eup %5547  ;;  %v5410_v63 = vunpack.i.h.bf16 %v5408_v60  ;;  %v5409_v0 = vunpack.i.l.bf16 %v5408_v60  ;;  %900 = vadd.xlane.f32.xlu0 %v899_v61 }
 0x366   : > { %4884 = vmatprep.mubr.msk.f32.mxu0 %vm841_vm3, %v5548_v62  ;;  %v902_v29 = vsel %vm841_vm3, %v5548_v62, 0.0 }
 0x367   : > { %v5550_v1 = vpop.eup %5549  ;;  %v5154_v2 = vpack.c.bf16 %v5410_v63, %v5409_v0 }
 0x368   : > { %4885 = vmatmul.mubr.msk.f32.vlgmr.msra.gmra.mrb[12].mxu0 %vm841_vm3, %v5550_v1  ;;  %v5428_v3 = vpop.permute.xlu0 %5427  ;;  %v905_v4 = vsel %vm841_vm3, %v5550_v1, 0.0 }
 0x369   : > { %906 = vadd.xlane.f32.xlu0 %v905_v4  ;;  %5155 = vmatprep.subr.bf16.mxu1 %v5154_v2  ;;  %v5429_v39 = vunpack.i.l.bf16 %v5428_v3 }
 0x36a   : > { %5157 = vmatpush3.bf16.msra.mxu1 %v5154_v2  ;;  %4895 = vmatpush3.msra.mxu0 %v1286_v56 }
 0x36b   : > { %v5552_v5 = vpop.eup %5551 }
 0x36c   : > { %4877 = vmatprep.mubr.msk.f32.mxu1 %vm841_vm3, %v5552_v5  ;;  %v5433_v6 = vpop.permute.xlu0 %5432  ;;  %v896_v7 = vsel %vm841_vm3, %v5552_v5, 0.0 }
 0x36d   : > { %v5435_v8 = vunpack.i.h.bf16 %v5433_v6  ;;  %v5434_v9 = vunpack.i.l.bf16 %v5433_v6  ;;  %897 = vadd.xlane.f32.xlu0 %v896_v7  ;;  %4878 = vmatmul.mubr.msk.f32.vlgmr.msra.gmra.mrb[6].mxu1 %vm841_vm3, %v5546_v59 }
 0x36e   : > { %5437 = vrot.lane.b32.xlu1 %v6196_v34, %s5867_s26 }
 0x36f   : > { %v6280_v10 = vpack.c.bf16 %v5435_v8, %v5434_v9 }
 0x371   : > { %5180 = vmatprep.subr.msk.bf16.mxu0 %vm6203_vm2, %v6280_v10 }
 0x383   : > { %1525 = vrot.lane.b32.xlu0 %v6169_v21, %s5868_s10 }
 0x38b   : > { %v862_v12 = vpop.xlane.xlu1 %861 }
 0x38c   : > { %v872_v14 = vsub.f32 %v6253_v17, %v862_v12  ;;  %v5430_v17 = vunpack.i.h.bf16 %v5428_v3 }
 0x38e   : > { %v886_v19 = vmul.f32 1.442695, %v872_v14  ;;  %v5172_v43 = vpack.c.bf16 %v5430_v17, %v5429_v39 }
 0x38f   : > { %v5418_v22 = vpop.permute.xlu1 %5417 }
 0x390   : > { %5553 = vpow2.f32 %v886_v19  ;;  %v5420_v24 = vunpack.i.h.bf16 %v5418_v22  ;;  %v5419_v27 = vunpack.i.l.bf16 %v5418_v22 }
 0x391   : > { %5555 = vpow2.f32 %v888_v15 }
 0x392   : > { %903 = vadd.xlane.f32.xlu1 %v902_v29  ;;  %v5162_v32 = vpack.c.bf16 %v5420_v24, %v5419_v27 }
 0x393   : > { %v5423_v35 = vpop.permute.xlu1 %5422 }
 0x394   : > { %v5425_v36 = vunpack.i.h.bf16 %v5423_v35  ;;  %v5424_v37 = vunpack.i.l.bf16 %v5423_v35  ;;  %5163 = vmatprep.subr.bf16.mxu1 %v5162_v32 }
 0x395   : > { %5165 = vmatpush3.bf16.msra.mxu1 %v5162_v32 }
 0x396   : > { %v5166_v13 = vpack.c.bf16 %v5425_v36, %v5424_v37 }
 0x397   : > { %v1433_v40 = vpop.permute.xlu1 %1432 }
 0x398   : > { %5168 = vmatprep.subr.msk.bf16.mxu1 %vm6203_vm2, %v5166_v13 }
 0x39a   : > { %v5554_v41 = vpop.eup %5553 }
 0x39b   : > { %v5556_v42 = vpop.eup %5555  ;;  %4891 = vmatprep.mubr.msk.f32.mxu1 %vm841_vm3, %v5554_v41  ;;  %v1435_v44 = vpop.permute.xlu1 %1434  ;;  %v908_v47 = vsel %vm841_vm3, %v5554_v41, 0.0 }
 0x39c   : > { %4892 = vmatmul.mubr.msk.f32.vlgmr.msra.gmra.mrb[8].mxu1 %vm841_vm3, %v5556_v42  ;;  %v911_v45 = vsel %vm841_vm3, %v5556_v42, 0.0  ;;  %v6334_v42 = vld [vmem:[#allocation9 + $0x18] sm:$0xff] }
 0x39d   : > { %4912 = vmatprep.mubr.msk.f32.mxu1 %vm480_vm1, %v1433_v40 }
 0x39e   : > { %5171 = vmatpush3.bf16.xpose.msk.msra.mxu1 %vm6203_vm2, %v5166_v13 }
 0x39f   : > { %5174 = vmatprep.subr.msk.bf16.mxu1 %vm6203_vm2, %v5172_v43  ;;  %v1524_v46 = vpop.permute.xlu1 %1523 }
 0x3a2   : > { %912 = vadd.xlane.f32.xlu0 %v911_v45 }
 0x3a3   : > { %1616 = vrot.lane.b32.xlu1 %v6178_v26, %s5868_s10 }
 0x3a5   : > { %4913 = vmatmul.mubr.msk.f32.vlgmr.msra.gmra.mrb[10].mxu1 %vm480_vm1, %v1435_v44 }
 0x3a6   : > { %5177 = vmatpush3.bf16.xpose.msk.msra.mxu1 %vm6203_vm2, %v5172_v43  ;;  %4919 = vmatprep.mubr.msk.f32.mxu1 %vm480_vm1, %v1524_v46  ;;  %v6336_v43 = vld [vmem:[#allocation9 + $0x10] sm:$0xff] }
 0x3b8   : > { %1614 = vrot.lane.b32.xlu0 %v6180_v28, %s5868_s10 }
 0x3bc   : > { %1705 = vrot.lane.b32.xlu0 %v6191_v33, %s5868_s10 }
 0x3c7   : > { %909 = vadd.xlane.f32.xlu1 %v908_v47 }
 0x3d8   : > { %1707 = vrot.lane.b32.xlu1 %v6189_v31, %s5868_s10 }
 0x3dc   : > { %5442 = vrot.lane.b32.xlu1 %v6167_v20, %s5869_s8 }
 0x3ea   : > { %v895_v48 = vpop.xlane.xlu1 %894 }
 0x3eb   : > { %v892_v49 = vpop.xlane.xlu0 %891 }
 0x3ec   : > { %5557 = vrcp.f32 %v892_v49 }
 0x3ed   : > { %5559 = vrcp.f32 %v895_v48 }
 0x3ee   : > { %v5438_v50 = vpop.permute.xlu1 %5437 }
 0x3ef   : > { %v5440_v51 = vunpack.i.h.bf16 %v5438_v50  ;;  %v5439_v52 = vunpack.i.l.bf16 %v5438_v50  ;;  %v5870_v50 = vmov 0.0  }
 0x3f0   : > { %467 = vst.msk [vmem:[#allocation2 + $0x8] sm:$0xff] %vm336_vm0, %v5870_v50  ;;  %466 = vst.msk [vmem:[#allocation2] sm:$0xff] %vm336_vm0, %v5870_v50 }
 0x3f1   : > { %v5184_v53 = vpack.c.bf16 %v5440_v51, %v5439_v52  ;;  %468 = vst.msk [vmem:[#allocation2 + $0x10] sm:$0xff] %vm336_vm0, %v5870_v50  ;;  %469 = vst.msk [vmem:[#allocation2 + $0x18] sm:$0xff] %vm336_vm0, %v5870_v50 }
 0x3f2   : > { %v901_v54 = vpop.xlane.xlu0 %900  ;;  %470 = vst.msk [vmem:[#allocation2 + $0x20] sm:$0xff] %vm336_vm0, %v5870_v50  ;;  %471 = vst.msk [vmem:[#allocation2 + $0x28] sm:$0xff] %vm336_vm0, %v5870_v50 }
 0x3f3   : > { %5186 = vmatprep.subr.msk.bf16.mxu1 %vm6203_vm2, %v5184_v53  ;;  %472 = vst.msk [vmem:[#allocation2 + $0x30] sm:$0xff] %vm336_vm0, %v5870_v50  ;;  %473 = vst.msk [vmem:[#allocation2 + $0x38] sm:$0xff] %vm336_vm0, %v5870_v50 }
 0x3f6   : > { %v907_v55 = vpop.xlane.xlu0 %906  ;;  %v5558_v60 = vpop.eup %5557 }
 0x3f7   : > { %5561 = vrcp.f32 %v907_v55  ;;  %v5560_v62 = vpop.eup %5559 }
 0x3fa   : > { %v898_v56 = vpop.xlane.xlu0 %897 }
 0x3fb   : > { %5563 = vrcp.f32 %v898_v56 }
 0x3fc   : > { %5565 = vrcp.f32 %v901_v54 }
 0x3fe   : > { %v1526_v57 = vpop.permute.xlu0 %1525 }
 0x3ff   : > { %4920 = vmatmul.mubr.msk.f32.vlgmr.msra.gmra.mrb[12].mxu1 %vm480_vm1, %v1526_v57  ;;  %v1279_v57 = vld [vmem:[#allocation2 + $0x8] sm:$0xff] }
 0x400   : > { %5189 = vmatpush3.bf16.xpose.msk.msra.mxu1 %vm6203_vm2, %v5184_v53 }
 0x401   : > { %v5562_v4 = vpop.eup %5561 }
 0x405   : > { %v5564_v9 = vpop.eup %5563 }
 0x406   : > { %v5566_v12 = vpop.eup %5565 }
 0x41f   : > { %v904_v2 = vpop.xlane.xlu1 %903 }
 0x420   : > { %5567 = vrcp.f32 %v904_v2 }
 0x42a   : > { %v5568_v15 = vpop.eup %5567 }
 0x42f   : > { %v913_v58 = vpop.xlane.xlu0 %912 }
 0x431   : > { %v4872_v59 = vpop.f32.mrb[10].mxu0 }
 0x432   : > { %v992_v61 = vpop.f32.mrb[11].mxu0  ;;  %v1271_v1 = vmul.f32 %v5560_v62, %v4872_v59 }
 0x433   : > { %v1270_v63 = vmul.f32 %v5558_v60, %v992_v61  ;;  %v1615_v0 = vpop.permute.xlu0 %1614 }
 0x435   : > { %4896 = vmatprep.mubr.msk.f32.mxu0 %vm480_vm1, %v1270_v63 }
 0x436   : > { %4897 = vmatmul.mubr.msk.f32.vlgmr.msra.gmra.mrb[14].mxu0 %vm480_vm1, %v1271_v1 }
 0x437   : > { %5183 = vmatpush3.bf16.xpose.msk.msra.mxu0 %vm6203_vm2, %v6280_v10  ;;  %v1706_v3 = vpop.permute.xlu0 %1705  ;;  %v1617_v10 = vpop.permute.xlu1 %1616 }
 0x438   : > { %4933 = vmatprep.mubr.msk.f32.mxu1 %vm480_vm1, %v1706_v3 }
 0x43b   : > { %v4886_v5 = vpop.f32.mrb[12].mxu0 }
 0x43c   : > { %v1275_v6 = vmul.f32 %v5562_v4, %v4886_v5  ;;  %v1166_v7 = vpop.f32.mrb[13].mxu0  ;;  %v1281_v5 = vld [vmem:[#allocation2 + $0x18] sm:$0xff] }
 0x43d   : > { %v1274_v22 = vmul.f32 %v5568_v15, %v1166_v7  ;;  %v1283_v15 = vld [vmem:[#allocation2 + $0x28] sm:$0xff] }
 0x440   : > { %v4879_v8 = vpop.f32.mrb[6].mxu1 }
 0x441   : > { %v1079_v11 = vpop.f32.mrb[7].mxu1  ;;  %v1273_v19 = vmul.f32 %v5566_v12, %v4879_v8 }
 0x442   : > { %v1272_v14 = vmul.f32 %v5564_v9, %v1079_v11 }
 0x444   : > { %4899 = vmatprep.mubr.msk.f32.mxu0 %vm480_vm1, %v1272_v14 }
 0x445   : > { %4900 = vmatmul.mubr.msk.f32.gmra.mrb[16].mxu0 %vm480_vm1, %v1273_v19  ;;  %v1282_v19 = vld [vmem:[#allocation2 + $0x20] sm:$0xff] }
 0x446   : > { %4902 = vmatprep.mubr.msk.f32.mxu0 %vm480_vm1, %v1274_v22 }
 0x449   : > { %4903 = vmatmul.mubr.msk.f32.gmra.mrb[18].mxu0 %vm480_vm1, %v1275_v6  ;;  %v1280_v6 = vld [vmem:[#allocation2 + $0x10] sm:$0xff] }
 0x454   : > { %v910_v24 = vpop.xlane.xlu1 %909 }
 0x455   : > { %5569 = vrcp.f32 %v910_v24 }
 0x456   : > { %5571 = vrcp.f32 %v913_v58  ;;  %v1278_v58 = vld [vmem:[#allocation2] sm:$0xff] }
 0x458   : > { %v1708_v27 = vpop.permute.xlu1 %1707 }
 0x459   : > { %4934 = vmatmul.mubr.msk.f32.vlgmr.msra.gmra.mrb[14].mxu1 %vm480_vm1, %v1708_v27 }
 0x45c   : > { %v5443_v29 = vpop.permute.xlu1 %5442 }
 0x45d   : > { %v5445_v32 = vunpack.i.h.bf16 %v5443_v29  ;;  %v5444_v35 = vunpack.i.l.bf16 %v5443_v29 }
 0x45f   : > { %v5190_v36 = vpack.c.bf16 %v5445_v32, %v5444_v35  ;;  %v5570_v13 = vpop.eup %5569 }
 0x460   : > { %v5572_v39 = vpop.eup %5571 }
 0x461   : > { %5191 = vmatprep.subr.bf16.mxu0 %v5190_v36 }
 0x46f   : > { %v4893_v37 = vpop.f32.mrb[8].mxu1 }
 0x470   : > { %v1253_v17 = vpop.f32.mrb[9].mxu1  ;;  %v1277_v41 = vmul.f32 %v5572_v39, %v4893_v37  ;;  %v1284_v39 = vld [vmem:[#allocation2 + $0x30] sm:$0xff] }
 0x471   : > { %v1276_v40 = vmul.f32 %v5570_v13, %v1253_v17  ;;  %v1285_v17 = vld [vmem:[#allocation2 + $0x38] sm:$0xff] }
 0x473   : > { %4905 = vmatprep.mubr.msk.f32.mxu0 %vm480_vm1, %v1276_v40 }
 0x474   : > { %4906 = vmatmul.mubr.msk.f32.gmra.mrb[20].mxu0 %vm480_vm1, %v1277_v41 }
 0x475   : > { %4926 = vmatprep.mubr.msk.f32.mxu0 %vm480_vm1, %v1615_v0 }
 0x478   : > { %v4914_v44 = vpop.f32.mrb[10].mxu1  ;;  %4927 = vmatmul.mubr.msk.f32.vlgmr.msra.gmra.mrb[22].mxu0 %vm480_vm1, %v1617_v10 }
 0x479   : > { %v1800_v45 = vadd.f32 %v4914_v44, %v6334_v42  ;;  %5193 = vmatpush3.bf16.msra.mxu0 %v5190_v36  ;;  %v1514_v46 = vpop.f32.mrb[11].mxu1 }
 0x47a   : > { %v1799_v47 = vadd.f32 %v6336_v43, %v1514_v46 }
 0x47b   : > { %v1810_v48 = vsel %vm841_vm3, %v1800_v45, -inf }
 0x47c   : > { %1811 = vmax.xlane.f32.xlu1 %v1810_v48  ;;  %v1807_v49 = vsel %vm841_vm3, %v1799_v47, -inf }
 0x47d   : > { %1808 = vmax.xlane.f32.xlu0 %v1807_v49 }
 0x4d2   : > { %v4921_v51 = vpop.f32.mrb[12].mxu1 }
 0x4d3   : > { %v6352_v52 = vadd.f32 %v4921_v51, %v6334_v42  ;;  %v1605_v53 = vpop.f32.mrb[13].mxu1 }
 0x4d4   : > { %v6355_v54 = vadd.f32 %v6336_v43, %v1605_v53 }
 0x4d5   : > { %v1816_v55 = vsel %vm841_vm3, %v6352_v52, -inf }
 0x4d6   : > { %1817 = vmax.xlane.f32.xlu0 %v1816_v55  ;;  %v1813_v56 = vsel %vm841_vm3, %v6355_v54, -inf }
 0x4da   : > { %1814 = vmax.xlane.f32.xlu0 %v1813_v56 }
 0x509   : > { %v1812_v59 = vpop.xlane.xlu1 %1811  ;;  %v4898_v60 = vpop.f32.mrb[14].mxu0 }
 0x50a   : > { %v1832_v61 = vsub.f32 %v1800_v45, %v1812_v59  ;;  %v1417_v62 = vadd.f32 %v4898_v60, %v1279_v57  ;;  %v1809_v63 = vpop.xlane.xlu0 %1808  ;;  %v1377_v0 = vpop.f32.mrb[15].mxu0 }
 0x50b   : > { %v1831_v1 = vsub.f32 %v1799_v47, %v1809_v63  ;;  %v1416_v2 = vadd.f32 %v1377_v0, %v1278_v58 }
 0x50c   : > { %v1841_v3 = vmul.f32 1.442695, %v1832_v61  ;;  %1425 = vst.msk [vmem:[#allocation2 + $0x8] sm:$0xff] %vm336_vm0, %v1417_v62 }
 0x50d   : > { %v1839_v4 = vmul.f32 1.442695, %v1831_v1  ;;  %1424 = vst.msk [vmem:[#allocation2] sm:$0xff] %vm336_vm0, %v1416_v2 }
 0x50f   : > { %5573 = vpow2.f32 %v1839_v4 }
 0x510   : > { %5575 = vpow2.f32 %v1841_v3 }
 0x518   : > { %v4901_v7 = vpop.f32.mrb[16].mxu0 }
 0x519   : > { %v5574_v8 = vpop.eup %5573  ;;  %v1419_v9 = vadd.f32 %v4901_v7, %v1281_v5  ;;  %v1387_v11 = vpop.f32.mrb[17].mxu0 }
 0x51a   : > { %v5576_v12 = vpop.eup %5575  ;;  %v1418_v14 = vadd.f32 %v1387_v11, %v1280_v6  ;;  %4940 = vmatprep.mubr.msk.f32.mxu0 %vm841_vm3, %v5574_v8  ;;  %v1855_v59 = vsel %vm841_vm3, %v5574_v8, 0.0  ;;  %v2252_v8 = vld [vmem:[#allocation8 + $0x8] sm:$0xff] }
 0x51b   : > { %1427 = vst.msk [vmem:[#allocation2 + $0x18] sm:$0xff] %vm336_vm0, %v1419_v9  ;;  %4941 = vmatmul.mubr.msk.f32.vlgmr.msra.gmra.mrb[24].mxu0 %vm841_vm3, %v5576_v12  ;;  %v1858_v62 = vsel %vm841_vm3, %v5576_v12, 0.0 }
 0x51c   : > { %1426 = vst.msk [vmem:[#allocation2 + $0x10] sm:$0xff] %vm336_vm0, %v1418_v14  ;;  %v4904_v22 = vpop.f32.mrb[18].mxu0 }
 0x51d   : > { %v1421_v10 = vadd.f32 %v4904_v22, %v1283_v15  ;;  %v1397_v24 = vpop.f32.mrb[19].mxu0 }
 0x51e   : > { %v1420_v27 = vadd.f32 %v1397_v24, %v1282_v19 }
 0x51f   : > { %1429 = vst.msk [vmem:[#allocation2 + $0x28] sm:$0xff] %vm336_vm0, %v1421_v10 }
 0x520   : > { %1428 = vst.msk [vmem:[#allocation2 + $0x20] sm:$0xff] %vm336_vm0, %v1420_v27 }
 0x52c   : > { %v4935_v29 = vpop.f32.mrb[14].mxu1 }
 0x52d   : > { %v1806_v32 = vadd.f32 %v4935_v29, %v6334_v42  ;;  %v1787_v35 = vpop.f32.mrb[15].mxu1 }
 0x52e   : > { %v1805_v36 = vadd.f32 %v6336_v43, %v1787_v35 }
 0x52f   : > { %v1828_v37 = vsel %vm841_vm3, %v1806_v32, -inf }
 0x530   : > { %1829 = vmax.xlane.f32.xlu0 %v1828_v37  ;;  %v1825_v13 = vsel %vm841_vm3, %v1805_v36, -inf }
 0x531   : > { %1826 = vmax.xlane.f32.xlu1 %v1825_v13 }
 0x542   : > { %5452 = vrot.lane.b32.xlu1 %v6187_v30, %s5869_s8 }
 0x547   : > { %v4907_v40 = vpop.f32.mrb[20].mxu0 }
 0x548   : > { %v1423_v41 = vadd.f32 %v4907_v40, %v1285_v17  ;;  %v1407_v44 = vpop.f32.mrb[21].mxu0 }
 0x549   : > { %v1422_v45 = vadd.f32 %v1407_v44, %v1284_v39 }
 0x54a   : > { %1431 = vst.msk [vmem:[#allocation2 + $0x38] sm:$0xff] %vm336_vm0, %v1423_v41 }
 0x54b   : > { %1430 = vst.msk [vmem:[#allocation2 + $0x30] sm:$0xff] %vm336_vm0, %v1422_v45  ;;  %v4928_v46 = vpop.f32.mrb[22].mxu0 }
 0x54c   : > { %v6378_v47 = vadd.f32 %v4928_v46, %v6334_v42  ;;  %v1696_v48 = vpop.f32.mrb[23].mxu0 }
 0x54d   : > { %v6383_v50 = vadd.f32 %v6336_v43, %v1696_v48 }
 0x54e   : > { %v1822_v49 = vsel %vm841_vm3, %v6378_v47, -inf }
 0x54f   : > { %1823 = vmax.xlane.f32.xlu0 %v1822_v49  ;;  %v1819_v53 = vsel %vm841_vm3, %v6383_v50, -inf }
 0x563   : > { %v1818_v51 = vpop.xlane.xlu0 %1817 }
 0x564   : > { %v1834_v58 = vsub.f32 %v6352_v52, %v1818_v51 }
 0x565   : > { %5447 = vrot.lane.b32.xlu0 %v6176_v25, %s5869_s8 }
 0x566   : > { %1820 = vmax.xlane.f32.xlu1 %v1819_v53  ;;  %v1845_v43 = vmul.f32 1.442695, %v1834_v58 }
 0x567   : > { %v1815_v55 = vpop.xlane.xlu0 %1814 }
 0x568   : > { %v1833_v42 = vsub.f32 %v6355_v54, %v1815_v55 }
 0x56a   : > { %v1843_v56 = vmul.f32 1.442695, %v1833_v42 }
 0x56c   : > { %5577 = vpow2.f32 %v1843_v56 }
 0x56d   : > { %5579 = vpow2.f32 %v1845_v43 }
 0x576   : > { %v5578_v57 = vpop.eup %5577 }
 0x577   : > { %4947 = vmatprep.mubr.msk.f32.mxu0 %vm841_vm3, %v5578_v57  ;;  %5457 = vrot.lane.b32.xlu1 %v6196_v34, %s5869_s8  ;;  %v1861_v60 = vsel %vm841_vm3, %v5578_v57, 0.0  ;;  %v5580_v61 = vpop.eup %5579  ;;  %s6671_s8 = scalar_lea.hbm %s6727_s6, %s4641_s19 }
 0x578   : > { %v1864_v54 = vsel %vm841_vm3, %v5580_v61, 0.0 }
 0x584   : > { %1856 = vadd.xlane.f32.xlu0 %v1855_v59 }
 0x588   : > { %1862 = vadd.xlane.f32.xlu0 %v1861_v60 }
 0x58c   : > { %1865 = vadd.xlane.f32.xlu0 %v1864_v54 }
 0x59b   : > { %1859 = vadd.xlane.f32.xlu1 %v1858_v62 }
 0x5bd   : > { %v1830_v52 = vpop.xlane.xlu0 %1829 }
 0x5be   : > { %v1838_v63 = vsub.f32 %v1806_v32, %v1830_v52  ;;  %v1827_v0 = vpop.xlane.xlu1 %1826 }
 0x5bf   : > { %v1837_v1 = vsub.f32 %v1805_v36, %v1827_v0 }
 0x5c0   : > { %v1853_v2 = vmul.f32 1.442695, %v1838_v63 }
 0x5c1   : > { %v1851_v3 = vmul.f32 1.442695, %v1837_v1 }
 0x5c2   : > { %5581 = vpow2.f32 %v1853_v2  ;;  %v5453_v4 = vpop.permute.xlu1 %5452 }
 0x5c3   : > { %5583 = vpow2.f32 %v1851_v3  ;;  %v5455_v5 = vunpack.i.h.bf16 %v5453_v4  ;;  %v5454_v6 = vunpack.i.l.bf16 %v5453_v4 }
 0x5c5   : > { %v5198_v7 = vpack.c.bf16 %v5455_v5, %v5454_v6 }
 0x5c7   : > { %5199 = vmatprep.subr.bf16.mxu1 %v5198_v7 }
 0x5c8   : > { %5201 = vmatpush3.bf16.msra.mxu1 %v5198_v7 }
 0x5c9   : > { %5286 = vmatprep.subr.mxu1 %v2252_v8 }
 0x5cc   : > { %v5582_v9 = vpop.eup %5581 }
 0x5cd   : > { %v5584_v11 = vpop.eup %5583  ;;  %v1876_v12 = vsel %vm841_vm3, %v5582_v9, 0.0 }
 0x5ce   : > { %1877 = vadd.xlane.f32.xlu0 %v1876_v12  ;;  %v1873_v14 = vsel %vm841_vm3, %v5584_v11, 0.0 }
 0x5cf   : > { %1874 = vadd.xlane.f32.xlu1 %v1873_v14 }
 0x5dc   : > { %v1824_v15 = vpop.xlane.xlu0 %1823 }
 0x5dd   : > { %v1836_v32 = vsub.f32 %v6378_v47, %v1824_v15 }
 0x5df   : > { %v1849_v37 = vmul.f32 1.442695, %v1836_v32 }
 0x5e0   : > { %v5448_v19 = vpop.permute.xlu0 %5447  ;;  %5462 = vrot.lane.b32.xlu1 %v6167_v20, %s5871_s16 }
 0x5e1   : > { %v5450_v22 = vunpack.i.h.bf16 %v5448_v19  ;;  %v5449_v10 = vunpack.i.l.bf16 %v5448_v19 }
 0x5e3   : > { %v5194_v24 = vpack.c.bf16 %v5450_v22, %v5449_v10 }
 0x5e4   : > { %5467 = vrot.lane.b32.xlu0 %v6176_v25, %s5871_s16  ;;  %2398 = vrot.lane.b32.xlu1 %v6161_v18, %s5872_s17 }
 0x5e5   : > { %5195 = vmatprep.subr.bf16.mxu0 %v5194_v24 }
 0x5e6   : > { %5197 = vmatpush3.bf16.msra.mxu0 %v5194_v24 }
 0x5e8   : > { %5472 = vrot.lane.b32.xlu0 %v6187_v30, %s5871_s16  ;;  %2400 = vrot.lane.b32.xlu1 %v6159_v16, %s5872_s17 }
 0x5e9   : > { %4948 = vmatmul.mubr.msk.f32.vlgmr.msra.gmra.mrb[26].mxu0 %vm841_vm3, %v5580_v61 }
 0x5ea   : > { %4961 = vmatprep.mubr.msk.f32.mxu0 %vm841_vm3, %v5584_v11 }
 0x5ec   : > { %5477 = vrot.lane.b32.xlu1 %v6196_v34, %s5871_s16  ;;  %s5783_s16 = scalar_lea.vmem %s6673_s9, 1024 }
 0x5ed   : > { %p5784_p10 = scmp.ne.s32.totalorder %s6673_s9, %s5783_s16 }
 0x5ee   : > { %v4942_v27 = vpop.f32.mrb[24].mxu0 }
 0x5ef   : > { %v1957_v29 = vpop.f32.mrb[25].mxu0  ;;  %p5785_p3 = pnand %p5784_p10, %p6069_p5 }
 0x5f0   : > { %2491 = vrot.lane.b32.xlu1 %v6169_v21, %s5872_s17 }
 0x5f1   : > { %p5786_p7 = pneg %p5785_p3 }
 0x5f3   : > { %v1821_v35 = vpop.xlane.xlu1 %1820 }
 0x5f4   : > { %v1835_v36 = vsub.f32 %v6383_v50, %v1821_v35 }
 0x5f6   : > { %v1847_v13 = vmul.f32 1.442695, %v1835_v36 }
 0x5f7   : > { %v5458_v17 = vpop.permute.xlu1 %5457 }
 0x5f8   : > { %5585 = vpow2.f32 %v1847_v13  ;;  %v5460_v39 = vunpack.i.h.bf16 %v5458_v17  ;;  %v5459_v40 = vunpack.i.l.bf16 %v5458_v17 }
 0x5f9   : > { %5587 = vpow2.f32 %v1849_v37 }
 0x5fa   : > { %v5202_v41 = vpack.c.bf16 %v5460_v39, %v5459_v40 }
 0x5fc   : > { %5203 = vmatprep.subr.bf16.mxu0 %v5202_v41 }
 0x5fd   : > { %5205 = vmatpush3.bf16.msra.mxu0 %v5202_v41 }
 0x5fe   : > { %4964 = vmatprep.subr.mxu0 %v2252_v8 }
 0x600   : > { %4962 = vmatmul.mubr.msk.f32.vlgmr.msra.gmra.mrb[28].mxu0 %vm841_vm3, %v5582_v9 }
 0x601   : > { %4965 = vmatpush3.msra.mxu0 %v2252_v8 }
 0x602   : > { %v5586_v44 = vpop.eup %5585 }
 0x603   : > { %v5588_v45 = vpop.eup %5587  ;;  %4954 = vmatprep.mubr.msk.f32.mxu1 %vm841_vm3, %v5586_v44  ;;  %v1867_v48 = vsel %vm841_vm3, %v5586_v44, 0.0 }
 0x604   : > { %4955 = vmatmul.mubr.msk.f32.vlgmr.msra.gmra.mrb[16].mxu1 %vm841_vm3, %v5588_v45  ;;  %v1870_v46 = vsel %vm841_vm3, %v5588_v45, 0.0 }
 0x605   : > { %5287 = vmatpush3.msra.mxu1 %v2252_v8 }
 0x607   : > { %1871 = vadd.xlane.f32.xlu0 %v1870_v46 }
 0x611   : > { %v1857_v47 = vpop.xlane.xlu0 %1856 }
 0x612   : > { %5589 = vrcp.f32 %v1857_v47 }
 0x614   : > { %1868 = vadd.xlane.f32.xlu1 %v1867_v48 }
 0x615   : > { %v1863_v42 = vpop.xlane.xlu0 %1862 }
 0x619   : > { %v1866_v56 = vpop.xlane.xlu0 %1865 }
 0x61c   : > { %v5590_v49 = vpop.eup %5589 }
 0x61d   : > { %2489 = vrot.lane.b32.xlu0 %v6171_v23, %s5872_s17  ;;  %v2235_v50 = vmul.f32 %v5590_v49, %v1957_v29 }
 0x61f   : > { %4966 = vmatprep.mubr.msk.f32.mxu0 %vm480_vm1, %v2235_v50 }
 0x621   : > { %2580 = vrot.lane.b32.xlu0 %v6180_v28, %s5872_s17 }
 0x625   : > { %2671 = vrot.lane.b32.xlu0 %v6191_v33, %s5872_s17  ;;  %2582 = vrot.lane.b32.xlu1 %v6178_v26, %s5872_s17 }
 0x628   : > { %v1860_v51 = vpop.xlane.xlu1 %1859 }
 0x629   : > { %5591 = vrcp.f32 %v1860_v51  ;;  %2673 = vrot.lane.b32.xlu1 %v6189_v31, %s5872_s17  ;;  %s5877_s17 = smov [#allocation11]  }
 0x62a   : > { %5593 = vrcp.f32 %v1863_v42 }
 0x62b   : > { %5595 = vrcp.f32 %v1866_v56  ;;  %v2244_v56 = vld [vmem:[#allocation2 + $0x8] sm:$0xff] }
 0x62d   : > { %5482 = vrot.lane.b32.xlu1 %v6167_v20, %s5873_s12 }
 0x633   : > { %v5592_v53 = vpop.eup %5591 }
 0x634   : > { %v2236_v55 = vmul.f32 %v5592_v53, %v4942_v27  ;;  %v5594_v9 = vpop.eup %5593 }
 0x635   : > { %v5596_v12 = vpop.eup %5595 }
 0x636   : > { %4967 = vmatmul.mubr.msk.f32.vlgmr.msra.gmra.mrb[30].mxu0 %vm480_vm1, %v2236_v55 }
 0x65b   : > { %v1878_v57 = vpop.xlane.xlu0 %1877 }
 0x65c   : > { %v1875_v58 = vpop.xlane.xlu1 %1874  ;;  %5597 = vrcp.f32 %v1878_v57 }
 0x65d   : > { %5599 = vrcp.f32 %v1875_v58 }
 0x65f   : > { %v5468_v43 = vpop.permute.xlu0 %5467 }
 0x660   : > { %v5463_v59 = vpop.permute.xlu1 %5462  ;;  %v5470_v60 = vunpack.i.h.bf16 %v5468_v43  ;;  %v5469_v61 = vunpack.i.l.bf16 %v5468_v43  ;;  %v2243_v43 = vld [vmem:[#allocation2] sm:$0xff] }
 0x661   : > { %v5465_v54 = vunpack.i.h.bf16 %v5463_v59  ;;  %v5464_v62 = vunpack.i.l.bf16 %v5463_v59 }
 0x662   : > { %v5212_v2 = vpack.c.bf16 %v5470_v60, %v5469_v61  ;;  %v2246_v61 = vld [vmem:[#allocation2 + $0x18] sm:$0xff] }
 0x663   : > { %v5206_v52 = vpack.c.bf16 %v5465_v54, %v5464_v62  ;;  %v5473_v63 = vpop.permute.xlu0 %5472 }
 0x664   : > { %v5475_v0 = vunpack.i.h.bf16 %v5473_v63  ;;  %v5474_v1 = vunpack.i.l.bf16 %v5473_v63  ;;  %v2399_v4 = vpop.permute.xlu1 %2398 }
 0x665   : > { %5208 = vmatprep.subr.msk.bf16.mxu0 %vm6203_vm2, %v5206_v52 }
 0x666   : > { %v5218_v3 = vpack.c.bf16 %v5475_v0, %v5474_v1  ;;  %5211 = vmatpush3.bf16.xpose.msk.msra.mxu0 %vm6203_vm2, %v5206_v52  ;;  %v5598_v13 = vpop.eup %5597  ;;  %v2245_v52 = vld [vmem:[#allocation2 + $0x10] sm:$0xff]  ;;  %v2764_v1 = vld [vmem:[#allocation9 + $0x28] sm:$0xff] }
 0x667   : > { %5214 = vmatprep.subr.msk.bf16.mxu0 %vm6203_vm2, %v5212_v2  ;;  %v5600_v39 = vpop.eup %5599 }
 0x668   : > { %5220 = vmatprep.subr.msk.bf16.mxu1 %vm6203_vm2, %v5218_v3  ;;  %v2401_v5 = vpop.permute.xlu1 %2400 }
 0x66c   : > { %v5478_v6 = vpop.permute.xlu1 %5477 }
 0x66d   : > { %v5480_v22 = vunpack.i.h.bf16 %v5478_v6  ;;  %v5479_v10 = vunpack.i.l.bf16 %v5478_v6 }
 0x66f   : > { %v5224_v29 = vpack.c.bf16 %v5480_v22, %v5479_v10 }
 0x670   : > { %v2492_v15 = vpop.permute.xlu1 %2491 }
 0x694   : > { %v1872_v7 = vpop.xlane.xlu0 %1871 }
 0x698   : > { %v2490_v24 = vpop.permute.xlu0 %2489 }
 0x69c   : > { %v2581_v32 = vpop.permute.xlu0 %2580 }
 0x6a0   : > { %v2672_v36 = vpop.permute.xlu0 %2671 }
 0x6a1   : > { %v1869_v27 = vpop.xlane.xlu1 %1868 }
 0x6a2   : > { %5601 = vrcp.f32 %v1869_v27 }
 0x6a3   : > { %5603 = vrcp.f32 %v1872_v7 }
 0x6a5   : > { %v2583_v35 = vpop.permute.xlu1 %2582 }
 0x6a9   : > { %v2674_v37 = vpop.permute.xlu1 %2673 }
 0x6ac   : > { %v5602_v47 = vpop.eup %5601 }
 0x6ad   : > { %v5483_v44 = vpop.permute.xlu1 %5482  ;;  %v5604_v51 = vpop.eup %5603 }
 0x6ae   : > { %v5485_v48 = vunpack.i.h.bf16 %v5483_v44  ;;  %v5484_v49 = vunpack.i.l.bf16 %v5483_v44 }
 0x6b0   : > { %v5230_v42 = vpack.c.bf16 %v5485_v48, %v5484_v49 }
 0x6bc   : > { %v4949_v8 = vpop.f32.mrb[26].mxu0 }
 0x6bd   : > { %v2044_v11 = vpop.f32.mrb[27].mxu0  ;;  %v2238_v19 = vmul.f32 %v5596_v12, %v4949_v8 }
 0x6be   : > { %v2237_v14 = vmul.f32 %v5594_v9, %v2044_v11 }
 0x6c0   : > { %4969 = vmatprep.mubr.msk.f32.mxu0 %vm480_vm1, %v2237_v14 }
 0x6c1   : > { %4970 = vmatmul.mubr.msk.f32.gmra.mrb[32].mxu0 %vm480_vm1, %v2238_v19 }
 0x6c2   : > { %4982 = vmatprep.mubr.msk.f32.mxu0 %vm480_vm1, %v2399_v4 }
 0x6c5   : > { %4983 = vmatmul.mubr.msk.f32.vlgmr.msra.gmra.mrb[34].mxu0 %vm480_vm1, %v2401_v5 }
 0x6c6   : > { %5217 = vmatpush3.bf16.xpose.msk.msra.mxu0 %vm6203_vm2, %v5212_v2  ;;  %4989 = vmatprep.mubr.msk.f32.mxu0 %vm480_vm1, %v2490_v24  ;;  %v2763_v2 = vld [vmem:[#allocation9 + $0x20] sm:$0xff] }
 0x6c7   : > { %5226 = vmatprep.subr.msk.bf16.mxu0 %vm6203_vm2, %v5224_v29 }
 0x6cd   : > { %4990 = vmatmul.mubr.msk.f32.vlgmr.msra.gmra.mrb[36].mxu0 %vm480_vm1, %v2492_v15 }
 0x6ce   : > { %5229 = vmatpush3.bf16.xpose.msk.msra.mxu0 %vm6203_vm2, %v5224_v29  ;;  %5003 = vmatprep.mubr.msk.f32.mxu0 %vm480_vm1, %v2672_v36 }
 0x6d3   : > { %v4963_v17 = vpop.f32.mrb[28].mxu0 }
 0x6d4   : > { %v2242_v40 = vmul.f32 %v5598_v13, %v4963_v17  ;;  %v2218_v41 = vpop.f32.mrb[29].mxu0  ;;  %v2247_v13 = vld [vmem:[#allocation2 + $0x20] sm:$0xff] }
 0x6d5   : > { %5004 = vmatmul.mubr.msk.f32.vlgmr.msra.gmra.mrb[38].mxu0 %vm480_vm1, %v2674_v37  ;;  %v2241_v45 = vmul.f32 %v5600_v39, %v2218_v41 }
 0x6d7   : > { %v4956_v46 = vpop.f32.mrb[16].mxu1 }
 0x6d8   : > { %v2131_v50 = vpop.f32.mrb[17].mxu1  ;;  %v2240_v55 = vmul.f32 %v5604_v51, %v4956_v46 }
 0x6d9   : > { %v2239_v53 = vmul.f32 %v5602_v47, %v2131_v50 }
 0x6db   : > { %4972 = vmatprep.mubr.msk.f32.mxu1 %vm480_vm1, %v2239_v53 }
 0x6dc   : > { %4973 = vmatmul.mubr.msk.f32.vlgmr.msra.gmra.mrb[18].mxu1 %vm480_vm1, %v2240_v55 }
 0x6dd   : > { %5223 = vmatpush3.bf16.xpose.msk.msra.mxu1 %vm6203_vm2, %v5218_v3  ;;  %4975 = vmatprep.mubr.msk.f32.mxu1 %vm480_vm1, %v2241_v45  ;;  %v2249_v45 = vld [vmem:[#allocation2 + $0x30] sm:$0xff] }
 0x6de   : > { %5231 = vmatprep.subr.bf16.mxu1 %v5230_v42 }
 0x6e0   : > { %4976 = vmatmul.mubr.msk.f32.gmra.mrb[20].mxu1 %vm480_vm1, %v2242_v40  ;;  %v2250_v40 = vld [vmem:[#allocation2 + $0x38] sm:$0xff] }
 0x6e1   : > { %4996 = vmatprep.mubr.msk.f32.mxu1 %vm480_vm1, %v2581_v32 }
 0x6e4   : > { %4997 = vmatmul.mubr.msk.f32.vlgmr.msra.gmra.mrb[22].mxu1 %vm480_vm1, %v2583_v35  ;;  %v2248_v35 = vld [vmem:[#allocation2 + $0x28] sm:$0xff] }
 0x6e5   : > { %5233 = vmatpush3.bf16.msra.mxu1 %v5230_v42 }
 0x709   : > { %v4968_v57 = vpop.f32.mrb[30].mxu0 }
 0x70a   : > { %v2383_v58 = vadd.f32 %v4968_v57, %v2244_v56  ;;  %v2343_v59 = vpop.f32.mrb[31].mxu0 }
 0x70b   : > { %v2382_v60 = vadd.f32 %v2343_v59, %v2243_v43 }
 0x70c   : > { %2391 = vst.msk [vmem:[#allocation2 + $0x8] sm:$0xff] %vm336_vm0, %v2383_v58 }
 0x70d   : > { %2390 = vst.msk [vmem:[#allocation2] sm:$0xff] %vm336_vm0, %v2382_v60 }
 0x794   : > { %v4971_v54 = vpop.f32.mrb[32].mxu0 }
 0x795   : > { %v2385_v62 = vadd.f32 %v4971_v54, %v2246_v61  ;;  %v2353_v63 = vpop.f32.mrb[33].mxu0 }
 0x796   : > { %v2384_v0 = vadd.f32 %v2353_v63, %v2245_v52 }
 0x797   : > { %2393 = vst.msk [vmem:[#allocation2 + $0x18] sm:$0xff] %vm336_vm0, %v2385_v62 }
 0x798   : > { %2392 = vst.msk [vmem:[#allocation2 + $0x10] sm:$0xff] %vm336_vm0, %v2384_v0  ;;  %v4984_v3 = vpop.f32.mrb[34].mxu0 }
 0x799   : > { %v2766_v4 = vadd.f32 %v4984_v3, %v2764_v1  ;;  %v2480_v5 = vpop.f32.mrb[35].mxu0 }
 0x79a   : > { %v2765_v6 = vadd.f32 %v2763_v2, %v2480_v5 }
 0x79b   : > { %v2776_v7 = vsel %vm841_vm3, %v2766_v4, -inf }
 0x79c   : > { %2777 = vmax.xlane.f32.xlu1 %v2776_v7  ;;  %v2773_v8 = vsel %vm841_vm3, %v2765_v6, -inf }
 0x79d   : > { %2774 = vmax.xlane.f32.xlu0 %v2773_v8 }
 0x7a0   : > { %v4991_v9 = vpop.f32.mrb[36].mxu0 }
 0x7a1   : > { %v2768_v11 = vadd.f32 %v4991_v9, %v2764_v1  ;;  %v2571_v12 = vpop.f32.mrb[37].mxu0 }
 0x7a2   : > { %v2767_v14 = vadd.f32 %v2763_v2, %v2571_v12 }
 0x7a3   : > { %v2782_v15 = vsel %vm841_vm3, %v2768_v11, -inf }
 0x7a4   : > { %2783 = vmax.xlane.f32.xlu0 %v2782_v15  ;;  %v2779_v19 = vsel %vm841_vm3, %v2767_v14, -inf }
 0x7a8   : > { %2780 = vmax.xlane.f32.xlu0 %v2779_v19  ;;  %v5005_v22 = vpop.f32.mrb[38].mxu0 }
 0x7a9   : > { %v2772_v10 = vadd.f32 %v5005_v22, %v2764_v1  ;;  %v2753_v24 = vpop.f32.mrb[39].mxu0 }
 0x7aa   : > { %v2771_v27 = vadd.f32 %v2763_v2, %v2753_v24 }
 0x7ab   : > { %v2794_v29 = vsel %vm841_vm3, %v2772_v10, -inf }
 0x7ac   : > { %2795 = vmax.xlane.f32.xlu0 %v2794_v29  ;;  %v2791_v32 = vsel %vm841_vm3, %v2771_v27, -inf }
 0x7ad   : > { %2792 = vmax.xlane.f32.xlu1 %v2791_v32 }
 0x7af   : > { %v4974_v36 = vpop.f32.mrb[18].mxu1 }
 0x7b0   : > { %v2387_v37 = vadd.f32 %v4974_v36, %v2248_v35  ;;  %v2363_v17 = vpop.f32.mrb[19].mxu1 }
 0x7b1   : > { %v2386_v39 = vadd.f32 %v2363_v17, %v2247_v13 }
 0x7b2   : > { %2395 = vst.msk [vmem:[#allocation2 + $0x28] sm:$0xff] %vm336_vm0, %v2387_v37 }
 0x7b3   : > { %2394 = vst.msk [vmem:[#allocation2 + $0x20] sm:$0xff] %vm336_vm0, %v2386_v39  ;;  %v4977_v41 = vpop.f32.mrb[20].mxu1 }
 0x7b4   : > { %v2389_v44 = vadd.f32 %v4977_v41, %v2250_v40  ;;  %v2373_v46 = vpop.f32.mrb[21].mxu1  ;;  %v3218_v40 = vld [vmem:[#allocation8 + $0x10] sm:$0xff] }
 0x7b5   : > { %v2388_v47 = vadd.f32 %v2373_v46, %v2249_v45 }
 0x7b6   : > { %2397 = vst.msk [vmem:[#allocation2 + $0x38] sm:$0xff] %vm336_vm0, %v2389_v44 }
 0x7b7   : > { %2396 = vst.msk [vmem:[#allocation2 + $0x30] sm:$0xff] %vm336_vm0, %v2388_v47  ;;  %v4998_v48 = vpop.f32.mrb[22].mxu1 }
 0x7b8   : > { %v6477_v49 = vadd.f32 %v4998_v48, %v2764_v1  ;;  %v2662_v50 = vpop.f32.mrb[23].mxu1 }
 0x7b9   : > { %v6479_v51 = vadd.f32 %v2763_v2, %v2662_v50 }
 0x7ba   : > { %v2788_v53 = vsel %vm841_vm3, %v6477_v49, -inf }
 0x7bb   : > { %2789 = vmax.xlane.f32.xlu0 %v2788_v53  ;;  %v2785_v55 = vsel %vm841_vm3, %v6479_v51, -inf }
 0x7be   : > { %5492 = vrot.lane.b32.xlu1 %v6187_v30, %s5873_s12 }
 0x7d1   : > { %5487 = vrot.lane.b32.xlu0 %v6176_v25, %s5873_s12 }
 0x7e2   : > { %2786 = vmax.xlane.f32.xlu1 %v2785_v55 }
 0x7f3   : > { %5497 = vrot.lane.b32.xlu1 %v6196_v34, %s5873_s12  ;;  %s5787_s12 = sshll.u32 %s5877_s17, 4  ;;  %s5788_s12 = int_to_ptr.vmem [resolvable:$false] %s5787_s12 }
 0x7f4   : > { %p5790_p12 = scmp.lt.s32.totalorder %s6673_s9, %s5788_s12 }
 0x829   : > { %v2778_v42 = vpop.xlane.xlu1 %2777 }
 0x82a   : > { %v2798_v56 = vsub.f32 %v2766_v4, %v2778_v42  ;;  %v2775_v57 = vpop.xlane.xlu0 %2774 }
 0x82b   : > { %v2797_v58 = vsub.f32 %v2765_v6, %v2775_v57 }
 0x82c   : > { %v2807_v43 = vmul.f32 1.442695, %v2798_v56 }
 0x82d   : > { %v2805_v59 = vmul.f32 1.442695, %v2797_v58 }
 0x82e   : > { %5605 = vpow2.f32 %v2807_v43 }
 0x82f   : > { %5607 = vpow2.f32 %v2805_v59 }
 0x831   : > { %v2784_v60 = vpop.xlane.xlu0 %2783 }
 0x832   : > { %v2800_v61 = vsub.f32 %v2768_v11, %v2784_v60 }
 0x834   : > { %v2811_v63 = vmul.f32 1.442695, %v2800_v61 }
 0x835   : > { %v2781_v54 = vpop.xlane.xlu0 %2780 }
 0x836   : > { %v2799_v62 = vsub.f32 %v2767_v14, %v2781_v54 }
 0x838   : > { %v5606_v52 = vpop.eup %5605  ;;  %v2809_v0 = vmul.f32 1.442695, %v2799_v62 }
 0x839   : > { %v5608_v1 = vpop.eup %5607  ;;  %v2796_v2 = vpop.xlane.xlu0 %2795  ;;  %v2824_v3 = vsel %vm841_vm3, %v5606_v52, 0.0 }
 0x83a   : > { %5609 = vpow2.f32 %v2809_v0  ;;  %v2804_v5 = vsub.f32 %v2772_v10, %v2796_v2  ;;  %v2793_v4 = vpop.xlane.xlu1 %2792  ;;  %5010 = vmatprep.mubr.msk.f32.mxu1 %vm841_vm3, %v5608_v1  ;;  %2825 = vadd.xlane.f32.xlu1 %v2824_v3  ;;  %v2821_v6 = vsel %vm841_vm3, %v5608_v1, 0.0 }
 0x83b   : > { %v2803_v7 = vsub.f32 %v2771_v27, %v2793_v4  ;;  %5011 = vmatmul.mubr.msk.f32.vlgmr.msra.gmra.mrb[24].mxu1 %vm841_vm3, %v5606_v52  ;;  %2822 = vadd.xlane.f32.xlu0 %v2821_v6  ;;  %5611 = vpow2.f32 %v2811_v63 }
 0x83c   : > { %v2819_v8 = vmul.f32 1.442695, %v2804_v5 }
 0x83d   : > { %v2817_v9 = vmul.f32 1.442695, %v2803_v7 }
 0x83e   : > { %v5493_v11 = vpop.permute.xlu1 %5492 }
 0x83f   : > { %5613 = vpow2.f32 %v2817_v9  ;;  %v5495_v12 = vunpack.i.h.bf16 %v5493_v11  ;;  %v5494_v14 = vunpack.i.l.bf16 %v5493_v11 }
 0x840   : > { %5615 = vpow2.f32 %v2819_v8 }
 0x841   : > { %v5238_v15 = vpack.c.bf16 %v5495_v12, %v5494_v14 }
 0x843   : > { %5239 = vmatprep.subr.bf16.mxu0 %v5238_v15 }
 0x844   : > { %v5610_v19 = vpop.eup %5609  ;;  %5241 = vmatpush3.bf16.msra.mxu0 %v5238_v15 }
 0x845   : > { %5017 = vmatprep.mubr.msk.f32.mxu1 %vm841_vm3, %v5610_v19  ;;  %v2827_v22 = vsel %vm841_vm3, %v5610_v19, 0.0  ;;  %v5612_v10 = vpop.eup %5611  ;;  %5034 = vmatprep.subr.mxu0 %v3218_v40 }
 0x846   : > { %2828 = vadd.xlane.f32.xlu0 %v2827_v22  ;;  %v2830_v29 = vsel %vm841_vm3, %v5612_v10, 0.0 }
 0x848   : > { %v2790_v24 = vpop.xlane.xlu0 %2789 }
 0x849   : > { %v5614_v27 = vpop.eup %5613  ;;  %v2802_v41 = vsub.f32 %v6477_v49, %v2790_v24 }
 0x84a   : > { %v5616_v32 = vpop.eup %5615  ;;  %2831 = vadd.xlane.f32.xlu0 %v2830_v29  ;;  %v2839_v35 = vsel %vm841_vm3, %v5614_v27, 0.0 }
 0x84b   : > { %2840 = vadd.xlane.f32.xlu1 %v2839_v35  ;;  %v2842_v37 = vsel %vm841_vm3, %v5616_v32, 0.0 }
 0x84c   : > { %v5488_v36 = vpop.permute.xlu0 %5487 }
 0x84d   : > { %v5490_v13 = vunpack.i.h.bf16 %v5488_v36  ;;  %v5489_v17 = vunpack.i.l.bf16 %v5488_v36 }
 0x84e   : > { %2843 = vadd.xlane.f32.xlu0 %v2842_v37 }
 0x84f   : > { %v5234_v39 = vpack.c.bf16 %v5490_v13, %v5489_v17 }
 0x851   : > { %5235 = vmatprep.subr.bf16.mxu1 %v5234_v39 }
 0x852   : > { %5237 = vmatpush3.bf16.msra.mxu1 %v5234_v39 }
 0x855   : > { %5018 = vmatmul.mubr.msk.f32.vlgmr.msra.gmra.mrb[26].mxu1 %vm841_vm3, %v5612_v10 }
 0x856   : > { %5031 = vmatprep.mubr.msk.f32.mxu1 %vm841_vm3, %v5614_v27 }
 0x85c   : > { %5502 = vrot.lane.b32.xlu1 %v6167_v20, %s5874_s20 }
 0x860   : > { %3364 = vrot.lane.b32.xlu1 %v6161_v18, %s5875_s7  ;;  %v2815_v18 = vmul.f32 1.442695, %v2802_v41 }
 0x864   : > { %5507 = vrot.lane.b32.xlu0 %v6176_v25, %s5874_s20  ;;  %3366 = vrot.lane.b32.xlu1 %v6159_v16, %s5875_s7 }
 0x868   : > { %5512 = vrot.lane.b32.xlu0 %v6187_v30, %s5874_s20  ;;  %5517 = vrot.lane.b32.xlu1 %v6196_v34, %s5874_s20  ;;  %s5789_s20 = scalar_lea.vmem %s5788_s12, 2048 }
 0x869   : > { %p5791_p1 = scmp.lt.s32.totalorder %s5789_s20, %s5783_s16 }
 0x86b   : > { %p5792_p2 = por %p5791_p1, %p5790_p12 }
 0x86c   : > { %3457 = vrot.lane.b32.xlu1 %v6169_v21, %s5875_s7 }
 0x86d   : > { %p5793_p4 = pnand %p5792_p2, %p5786_p7 }
 0x86f   : > { %v2787_v44 = vpop.xlane.xlu1 %2786 }
 0x870   : > { %v2801_v45 = vsub.f32 %v6479_v51, %v2787_v44 }
 0x872   : > { %v2813_v46 = vmul.f32 1.442695, %v2801_v45 }
 0x873   : > { %v5498_v47 = vpop.permute.xlu1 %5497 }
 0x874   : > { %5617 = vpow2.f32 %v2813_v46  ;;  %v5500_v48 = vunpack.i.h.bf16 %v5498_v47  ;;  %v5499_v16 = vunpack.i.l.bf16 %v5498_v47 }
 0x875   : > { %5619 = vpow2.f32 %v2815_v18 }
 0x876   : > { %v5242_v50 = vpack.c.bf16 %v5500_v48, %v5499_v16 }
 0x878   : > { %5243 = vmatprep.subr.bf16.mxu1 %v5242_v50 }
 0x879   : > { %5245 = vmatpush3.bf16.msra.mxu1 %v5242_v50 }
 0x87c   : > { %5032 = vmatmul.mubr.msk.f32.vlgmr.msra.gmra.mrb[28].mxu1 %vm841_vm3, %v5616_v32 }
 0x87e   : > { %v5618_v53 = vpop.eup %5617 }
 0x87f   : > { %v5620_v55 = vpop.eup %5619  ;;  %5024 = vmatprep.mubr.msk.f32.mxu0 %vm841_vm3, %v5618_v53  ;;  %v2833_v49 = vsel %vm841_vm3, %v5618_v53, 0.0 }
 0x880   : > { %5025 = vmatmul.mubr.msk.f32.vlgmr.msra.gmra.mrb[40].mxu0 %vm841_vm3, %v5620_v55  ;;  %v2836_v21 = vsel %vm841_vm3, %v5620_v55, 0.0 }
 0x881   : > { %5035 = vmatpush3.msra.mxu0 %v3218_v40 }
 0x887   : > { %2837 = vadd.xlane.f32.xlu0 %v2836_v21 }
 0x890   : > { %2834 = vadd.xlane.f32.xlu1 %v2833_v49  ;;  %v3730_v49 = vld [vmem:[#allocation9 + $0x38] sm:$0xff] }
 0x89d   : > { %3455 = vrot.lane.b32.xlu0 %v6171_v23, %s5875_s7 }
 0x8a1   : > { %3546 = vrot.lane.b32.xlu0 %v6180_v28, %s5875_s7  ;;  %3548 = vrot.lane.b32.xlu1 %v6178_v26, %s5875_s7 }
 0x8a5   : > { %3637 = vrot.lane.b32.xlu0 %v6191_v33, %s5875_s7  ;;  %3639 = vrot.lane.b32.xlu1 %v6189_v31, %s5875_s7 }
 0x8a9   : > { %5522 = vrot.lane.b32.xlu1 %v6167_v20, %s5876_s11 }
 0x8c7   : > { %v2826_v56 = vpop.xlane.xlu1 %2825 }
 0x8c8   : > { %v2823_v51 = vpop.xlane.xlu0 %2822 }
 0x8c9   : > { %5621 = vrcp.f32 %v2823_v51  ;;  %v3729_v51 = vld [vmem:[#allocation9 + $0x30] sm:$0xff] }
 0x8ca   : > { %5623 = vrcp.f32 %v2826_v56 }
 0x8d3   : > { %v2829_v42 = vpop.xlane.xlu0 %2828  ;;  %v5622_v6 = vpop.eup %5621 }
 0x8d4   : > { %v5624_v8 = vpop.eup %5623 }
 0x8d7   : > { %v2832_v23 = vpop.xlane.xlu0 %2831 }
 0x8d8   : > { %v6531_v57 = vpop.xlane.xlu1 %2840  ;;  %5625 = vrcp.f32 %v2832_v23 }
 0x8d9   : > { %5627 = vrcp.f32 %v2829_v42 }
 0x8db   : > { %v6533_v28 = vpop.xlane.xlu0 %2843 }
 0x8dc   : > { %v5503_v58 = vpop.permute.xlu1 %5502  ;;  %5629 = vrcp.f32 %v6533_v28 }
 0x8dd   : > { %v5505_v26 = vunpack.i.h.bf16 %v5503_v58  ;;  %v5504_v43 = vunpack.i.l.bf16 %v5503_v58  ;;  %5631 = vrcp.f32 %v6531_v57 }
 0x8df   : > { %v5246_v59 = vpack.c.bf16 %v5505_v26, %v5504_v43  ;;  %v5508_v33 = vpop.permute.xlu0 %5507  ;;  %v3210_v26 = vld [vmem:[#allocation2 + $0x8] sm:$0xff] }
 0x8e0   : > { %v5510_v60 = vunpack.i.h.bf16 %v5508_v33  ;;  %v5509_v61 = vunpack.i.l.bf16 %v5508_v33  ;;  %v3365_v31 = vpop.permute.xlu1 %3364  ;;  %v3209_v33 = vld [vmem:[#allocation2] sm:$0xff] }
 0x8e1   : > { %5248 = vmatprep.subr.msk.bf16.mxu1 %vm6203_vm2, %v5246_v59  ;;  %5052 = vmatprep.mubr.msk.f32.mxu1 %vm480_vm1, %v3365_v31 }
 0x8e2   : > { %v5252_v20 = vpack.c.bf16 %v5510_v60, %v5509_v61  ;;  %5251 = vmatpush3.bf16.xpose.msk.msra.mxu1 %vm6203_vm2, %v5246_v59  ;;  %v5626_v29 = vpop.eup %5625 }
 0x8e3   : > { %v5513_v54 = vpop.permute.xlu0 %5512  ;;  %v5628_v35 = vpop.eup %5627 }
 0x8e4   : > { %v5515_v62 = vunpack.i.h.bf16 %v5513_v54  ;;  %v5514_v52 = vunpack.i.l.bf16 %v5513_v54  ;;  %v3367_v63 = vpop.permute.xlu1 %3366  ;;  %5254 = vmatprep.subr.msk.bf16.mxu1 %vm6203_vm2, %v5252_v20 }
 0x8e6   : > { %v5258_v0 = vpack.c.bf16 %v5515_v62, %v5514_v52  ;;  %v5630_v41 = vpop.eup %5629 }
 0x8e7   : > { %v5632_v45 = vpop.eup %5631 }
 0x8e8   : > { %5260 = vmatprep.subr.msk.bf16.mxu0 %vm6203_vm2, %v5258_v0  ;;  %v5518_v1 = vpop.permute.xlu1 %5517 }
 0x8e9   : > { %v5520_v2 = vunpack.i.h.bf16 %v5518_v1  ;;  %v5519_v3 = vunpack.i.l.bf16 %v5518_v1  ;;  %5053 = vmatmul.mubr.msk.f32.vlgmr.msra.gmra.mrb[30].mxu1 %vm480_vm1, %v3367_v63 }
 0x8ea   : > { %5257 = vmatpush3.bf16.xpose.msk.msra.mxu1 %vm6203_vm2, %v5252_v20 }
 0x8eb   : > { %v5264_v5 = vpack.c.bf16 %v5520_v2, %v5519_v3 }
 0x8ec   : > { %v3458_v15 = vpop.permute.xlu1 %3457 }
 0x8ed   : > { %5266 = vmatprep.subr.msk.bf16.mxu1 %vm6203_vm2, %v5264_v5 }
 0x90e   : > { %v5012_v4 = vpop.f32.mrb[24].mxu1 }
 0x90f   : > { %v2923_v7 = vpop.f32.mrb[25].mxu1  ;;  %v3202_v11 = vmul.f32 %v5624_v8, %v5012_v4 }
 0x910   : > { %v3201_v9 = vmul.f32 %v5622_v6, %v2923_v7  ;;  %v3212_v6 = vld [vmem:[#allocation2 + $0x18] sm:$0xff] }
 0x912   : > { %5036 = vmatprep.mubr.msk.f32.mxu0 %vm480_vm1, %v3201_v9  ;;  %v3211_v9 = vld [vmem:[#allocation2 + $0x10] sm:$0xff] }
 0x913   : > { %5037 = vmatmul.mubr.msk.f32.vlgmr.msra.gmra.mrb[42].mxu0 %vm480_vm1, %v3202_v11 }
 0x914   : > { %v2838_v12 = vpop.xlane.xlu0 %2837  ;;  %5263 = vmatpush3.bf16.xpose.msk.msra.mxu0 %vm6203_vm2, %v5258_v0 }
 0x918   : > { %v3456_v14 = vpop.permute.xlu0 %3455 }
 0x919   : > { %5059 = vmatprep.mubr.msk.f32.mxu1 %vm480_vm1, %v3456_v14  ;;  %v3214_v14 = vld [vmem:[#allocation2 + $0x28] sm:$0xff] }
 0x91a   : > { %5060 = vmatmul.mubr.msk.f32.vlgmr.msra.gmra.mrb[32].mxu1 %vm480_vm1, %v3458_v15 }
 0x91b   : > { %5269 = vmatpush3.bf16.xpose.msk.msra.mxu1 %vm6203_vm2, %v5264_v5 }
 0x91c   : > { %v3547_v19 = vpop.permute.xlu0 %3546 }
 0x91d   : > { %v2835_v22 = vpop.xlane.xlu1 %2834 }
 0x91e   : > { %5633 = vrcp.f32 %v2835_v22  ;;  %v3213_v22 = vld [vmem:[#allocation2 + $0x20] sm:$0xff] }
 0x91f   : > { %5635 = vrcp.f32 %v2838_v12 }
 0x920   : > { %v3638_v10 = vpop.permute.xlu0 %3637 }
 0x921   : > { %v3549_v24 = vpop.permute.xlu1 %3548  ;;  %5073 = vmatprep.mubr.msk.f32.mxu1 %vm480_vm1, %v3638_v10 }
 0x925   : > { %v3640_v27 = vpop.permute.xlu1 %3639 }
 0x926   : > { %5074 = vmatmul.mubr.msk.f32.vlgmr.msra.gmra.mrb[34].mxu1 %vm480_vm1, %v3640_v27  ;;  %v3216_v27 = vld [vmem:[#allocation2 + $0x38] sm:$0xff] }
 0x928   : > { %v5019_v32 = vpop.f32.mrb[26].mxu1  ;;  %v5634_v16 = vpop.eup %5633 }
 0x929   : > { %v5523_v36 = vpop.permute.xlu1 %5522  ;;  %v3204_v37 = vmul.f32 %v5626_v29, %v5019_v32  ;;  %v3010_v13 = vpop.f32.mrb[27].mxu1 }
 0x92a   : > { %v5525_v17 = vunpack.i.h.bf16 %v5523_v36  ;;  %v5524_v38 = vunpack.i.l.bf16 %v5523_v36  ;;  %v3203_v39 = vmul.f32 %v5628_v35, %v3010_v13  ;;  %v5636_v53 = vpop.eup %5635  ;;  %v3215_v35 = vld [vmem:[#allocation2 + $0x30] sm:$0xff] }
 0x92c   : > { %v5270_v40 = vpack.c.bf16 %v5525_v17, %v5524_v38  ;;  %5039 = vmatprep.mubr.msk.f32.mxu0 %vm480_vm1, %v3203_v39 }
 0x92d   : > { %5040 = vmatmul.mubr.msk.f32.gmra.mrb[44].mxu0 %vm480_vm1, %v3204_v37 }
 0x92e   : > { %5271 = vmatprep.subr.bf16.mxu0 %v5270_v40 }
 0x94f   : > { %v5033_v44 = vpop.f32.mrb[28].mxu1 }
 0x950   : > { %v3208_v18 = vmul.f32 %v5630_v41, %v5033_v44  ;;  %v3184_v46 = vpop.f32.mrb[29].mxu1 }
 0x951   : > { %v3207_v47 = vmul.f32 %v5632_v45, %v3184_v46 }
 0x953   : > { %v5026_v48 = vpop.f32.mrb[40].mxu0 }
 0x954   : > { %v3097_v50 = vpop.f32.mrb[41].mxu0  ;;  %v3206_v21 = vmul.f32 %v5636_v53, %v5026_v48 }
 0x955   : > { %v3205_v55 = vmul.f32 %v5634_v16, %v3097_v50 }
 0x957   : > { %5042 = vmatprep.mubr.msk.f32.mxu0 %vm480_vm1, %v3205_v55 }
 0x958   : > { %5043 = vmatmul.mubr.msk.f32.gmra.mrb[46].mxu0 %vm480_vm1, %v3206_v21 }
 0x959   : > { %5045 = vmatprep.mubr.msk.f32.mxu0 %vm480_vm1, %v3207_v47 }
 0x95c   : > { %5046 = vmatmul.mubr.msk.f32.gmra.mrb[48].mxu0 %vm480_vm1, %v3208_v18 }
 0x95d   : > { %5066 = vmatprep.mubr.msk.f32.mxu0 %vm480_vm1, %v3547_v19 }
 0x960   : > { %5067 = vmatmul.mubr.msk.f32.vlgmr.msra.gmra.mrb[50].mxu0 %vm480_vm1, %v3549_v24 }
 0x961   : > { %5273 = vmatpush3.bf16.msra.mxu0 %v5270_v40 }
 0x9bc   : > { %v5054_v42 = vpop.f32.mrb[30].mxu1 }
 0x9bd   : > { %v6569_v56 = vadd.f32 %v5054_v42, %v3730_v49  ;;  %v3446_v23 = vpop.f32.mrb[31].mxu1 }
 0x9be   : > { %v6571_v57 = vadd.f32 %v3729_v51, %v3446_v23 }
 0x9bf   : > { %v3742_v28 = vsel %vm841_vm3, %v6569_v56, -inf }
 0x9c0   : > { %3743 = vmax.xlane.f32.xlu1 %v3742_v28  ;;  %v3739_v58 = vsel %vm841_vm3, %v6571_v57, -inf }
 0x9c1   : > { %3740 = vmax.xlane.f32.xlu0 %v3739_v58 }
 0x9e6   : > { %v5038_v43 = vpop.f32.mrb[42].mxu0 }
 0x9e7   : > { %v3349_v59 = vadd.f32 %v5038_v43, %v3210_v26  ;;  %v3309_v60 = vpop.f32.mrb[43].mxu0 }
 0x9e8   : > { %v3348_v61 = vadd.f32 %v3309_v60, %v3209_v33  ;;  %v4184_v33 = vld [vmem:[#allocation8 + $0x18] sm:$0xff] }
 0x9e9   : > { %3357 = vst.msk [vmem:[#allocation2 + $0x8] sm:$0xff] %vm336_vm0, %v3349_v59 }
 0x9ea   : > { %3356 = vst.msk [vmem:[#allocation2] sm:$0xff] %vm336_vm0, %v3348_v61 }
 0x9ed   : > { %v5061_v31 = vpop.f32.mrb[32].mxu1 }
 0x9ee   : > { %v6579_v20 = vadd.f32 %v5061_v31, %v3730_v49  ;;  %v3537_v54 = vpop.f32.mrb[33].mxu1 }
 0x9ef   : > { %v6581_v62 = vadd.f32 %v3729_v51, %v3537_v54 }
 0x9f0   : > { %v3748_v52 = vsel %vm841_vm3, %v6579_v20, -inf }
 0x9f1   : > { %3749 = vmax.xlane.f32.xlu0 %v3748_v52  ;;  %v3745_v63 = vsel %vm841_vm3, %v6581_v62, -inf }
 0x9f5   : > { %3746 = vmax.xlane.f32.xlu0 %v3745_v63 }
 0x9f9   : > { %v5075_v0 = vpop.f32.mrb[34].mxu1 }
 0x9fa   : > { %v6587_v1 = vadd.f32 %v5075_v0, %v3730_v49  ;;  %v3719_v2 = vpop.f32.mrb[35].mxu1 }
 0x9fb   : > { %v6589_v3 = vadd.f32 %v3729_v51, %v3719_v2 }
 0x9fc   : > { %v3760_v5 = vsel %vm841_vm3, %v6587_v1, -inf }
 0x9fd   : > { %3761 = vmax.xlane.f32.xlu0 %v3760_v5  ;;  %v3757_v4 = vsel %vm841_vm3, %v6589_v3, -inf }
 0x9fe   : > { %3758 = vmax.xlane.f32.xlu1 %v3757_v4 }
 0xa00   : > { %v5041_v7 = vpop.f32.mrb[44].mxu0 }
 0xa01   : > { %v3351_v8 = vadd.f32 %v5041_v7, %v3212_v6  ;;  %v3319_v11 = vpop.f32.mrb[45].mxu0 }
 0xa02   : > { %v3350_v12 = vadd.f32 %v3319_v11, %v3211_v9 }
 0xa03   : > { %3359 = vst.msk [vmem:[#allocation2 + $0x18] sm:$0xff] %vm336_vm0, %v3351_v8 }
 0xa04   : > { %3358 = vst.msk [vmem:[#allocation2 + $0x10] sm:$0xff] %vm336_vm0, %v3350_v12 }
 0xa0f   : > { %5532 = vrot.lane.b32.xlu1 %v6187_v30, %s5876_s11 }
 0xa2b   : > { %v5044_v15 = vpop.f32.mrb[46].mxu0 }
 0xa2c   : > { %v3353_v19 = vadd.f32 %v5044_v15, %v3214_v14  ;;  %v3329_v10 = vpop.f32.mrb[47].mxu0 }
 0xa2d   : > { %v3352_v24 = vadd.f32 %v3329_v10, %v3213_v22 }
 0xa2e   : > { %3361 = vst.msk [vmem:[#allocation2 + $0x28] sm:$0xff] %vm336_vm0, %v3353_v19 }
 0xa2f   : > { %3360 = vst.msk [vmem:[#allocation2 + $0x20] sm:$0xff] %vm336_vm0, %v3352_v24  ;;  %v5047_v29 = vpop.f32.mrb[48].mxu0 }
 0xa30   : > { %v3355_v32 = vadd.f32 %v5047_v29, %v3216_v27  ;;  %v3339_v36 = vpop.f32.mrb[49].mxu0 }
 0xa31   : > { %v3354_v37 = vadd.f32 %v3339_v36, %v3215_v35 }
 0xa32   : > { %3363 = vst.msk [vmem:[#allocation2 + $0x38] sm:$0xff] %vm336_vm0, %v3355_v32 }
 0xa33   : > { %3362 = vst.msk [vmem:[#allocation2 + $0x30] sm:$0xff] %vm336_vm0, %v3354_v37  ;;  %v5068_v30 = vpop.f32.mrb[50].mxu0 }
 0xa34   : > { %v3736_v13 = vadd.f32 %v5068_v30, %v3730_v49  ;;  %v3628_v17 = vpop.f32.mrb[51].mxu0 }
 0xa35   : > { %v3735_v38 = vadd.f32 %v3729_v51, %v3628_v17 }
 0xa36   : > { %v3754_v39 = vsel %vm841_vm3, %v3736_v13, -inf }
 0xa37   : > { %3755 = vmax.xlane.f32.xlu0 %v3754_v39  ;;  %v3751_v40 = vsel %vm841_vm3, %v3735_v38, -inf }
 0xa38   : > { %3752 = vmax.xlane.f32.xlu1 %v3751_v40 }
 0xa49   : > { %5537 = vrot.lane.b32.xlu1 %v6196_v34, %s5876_s11 }
 0xa4d   : > { %v3744_v41 = vpop.xlane.xlu1 %3743  ;;  %5527 = vrot.lane.b32.xlu0 %v6176_v25, %s5876_s11 }
 0xa4e   : > { %v3764_v44 = vsub.f32 %v6569_v56, %v3744_v41  ;;  %v3741_v45 = vpop.xlane.xlu0 %3740 }
 0xa4f   : > { %v3763_v18 = vsub.f32 %v6571_v57, %v3741_v45 }
 0xa50   : > { %v3773_v46 = vmul.f32 1.442695, %v3764_v44 }
 0xa51   : > { %v3771_v47 = vmul.f32 1.442695, %v3763_v18 }
 0xa53   : > { %5637 = vpow2.f32 %v3771_v47 }
 0xa54   : > { %5639 = vpow2.f32 %v3773_v46 }
 0xa5d   : > { %v5638_v48 = vpop.eup %5637 }
 0xa5e   : > { %v5640_v16 = vpop.eup %5639  ;;  %5080 = vmatprep.mubr.msk.f32.mxu0 %vm841_vm3, %v5638_v48  ;;  %v3787_v34 = vsel %vm841_vm3, %v5638_v48, 0.0 }
 0xa5f   : > { %5081 = vmatmul.mubr.msk.f32.vlgmr.msra.gmra.mrb[52].mxu0 %vm841_vm3, %v5640_v16  ;;  %v3790_v25 = vsel %vm841_vm3, %v5640_v16, 0.0 }
 0xa6c   : > { %3788 = vadd.xlane.f32.xlu0 %v3787_v34 }
 0xa6d   : > { %3791 = vadd.xlane.f32.xlu1 %v3790_v25 }
 0xa7e   : > { %v3750_v50 = vpop.xlane.xlu0 %3749 }
 0xa7f   : > { %v3766_v53 = vsub.f32 %v6579_v20, %v3750_v50 }
 0xa81   : > { %v3777_v49 = vmul.f32 1.442695, %v3766_v53 }
 0xa82   : > { %v3747_v55 = vpop.xlane.xlu0 %3746 }
 0xa83   : > { %v3765_v21 = vsub.f32 %v6581_v62, %v3747_v55 }
 0xa85   : > { %v3775_v51 = vmul.f32 1.442695, %v3765_v21 }
 0xa87   : > { %5641 = vpow2.f32 %v3775_v51 }
 0xa88   : > { %5643 = vpow2.f32 %v3777_v49 }
 0xa8a   : > { %v3762_v61 = vpop.xlane.xlu0 %3761 }
 0xa8b   : > { %v3759_v42 = vpop.xlane.xlu1 %3758  ;;  %v3770_v31 = vsub.f32 %v6587_v1, %v3762_v61  ;;  %v4631_v61 = vld [vmem:[%s6725_s4] ss:$0 sm:$0xff] }
 0xa8c   : > { %v3769_v60 = vsub.f32 %v6589_v3, %v3759_v42 }
 0xa8d   : > { %v3785_v0 = vmul.f32 1.442695, %v3770_v31 }
 0xa8e   : > { %v3783_v20 = vmul.f32 1.442695, %v3769_v60 }
 0xa8f   : > { %v5533_v56 = vpop.permute.xlu1 %5532 }
 0xa90   : > { %v5535_v23 = vunpack.i.h.bf16 %v5533_v56  ;;  %v5534_v57 = vunpack.i.l.bf16 %v5533_v56  ;;  %5645 = vpow2.f32 %v3783_v20 }
 0xa91   : > { %v5642_v28 = vpop.eup %5641 }
 0xa92   : > { %v5278_v58 = vpack.c.bf16 %v5535_v23, %v5534_v57  ;;  %5087 = vmatprep.mubr.msk.f32.mxu0 %vm841_vm3, %v5642_v28  ;;  %v3793_v26 = vsel %vm841_vm3, %v5642_v28, 0.0  ;;  %v5644_v43 = vpop.eup %5643 }
 0xa93   : > { %3794 = vadd.xlane.f32.xlu0 %v3793_v26  ;;  %v3796_v59 = vsel %vm841_vm3, %v5644_v43, 0.0 }
 0xa94   : > { %5279 = vmatprep.subr.bf16.mxu1 %v5278_v58 }
 0xa95   : > { %5281 = vmatpush3.bf16.msra.mxu1 %v5278_v58  ;;  %v4176_v58 = vld [vmem:[#allocation2 + $0x8] sm:$0xff] }
 0xa96   : > { %5104 = vmatprep.subr.mxu1 %v4184_v33 }
 0xa97   : > { %3797 = vadd.xlane.f32.xlu0 %v3796_v59  ;;  %v4175_v59 = vld [vmem:[#allocation2] sm:$0xff] }
 0xa9a   : > { %v5646_v12 = vpop.eup %5645 }
 0xa9b   : > { %v3805_v27 = vsel %vm841_vm3, %v5646_v12, 0.0 }
 0xac4   : > { %v3756_v54 = vpop.xlane.xlu0 %3755 }
 0xac5   : > { %v3768_v62 = vsub.f32 %v3736_v13, %v3756_v54  ;;  %v3753_v52 = vpop.xlane.xlu1 %3752 }
 0xac6   : > { %v3767_v63 = vsub.f32 %v3735_v38, %v3753_v52  ;;  %v4178_v52 = vld [vmem:[#allocation2 + $0x18] sm:$0xff] }
 0xac7   : > { %v3781_v2 = vmul.f32 1.442695, %v3768_v62 }
 0xac8   : > { %v3779_v5 = vmul.f32 1.442695, %v3767_v63  ;;  %v5528_v4 = vpop.permute.xlu0 %5527 }
 0xac9   : > { %5647 = vpow2.f32 %v3781_v2  ;;  %v5530_v6 = vunpack.i.h.bf16 %v5528_v4  ;;  %v5529_v7 = vunpack.i.l.bf16 %v5528_v4  ;;  %v5538_v8 = vpop.permute.xlu1 %5537  ;;  %v4177_v2 = vld [vmem:[#allocation2 + $0x10] sm:$0xff] }
 0xaca   : > { %5649 = vpow2.f32 %v3779_v5  ;;  %v5540_v9 = vunpack.i.h.bf16 %v5538_v8  ;;  %v5539_v3 = vunpack.i.l.bf16 %v5538_v8 }
 0xacb   : > { %5651 = vpow2.f32 %v3785_v0  ;;  %v5274_v11 = vpack.c.bf16 %v5530_v6, %v5529_v7  ;;  %v4180_v6 = vld [vmem:[#allocation2 + $0x28] sm:$0xff] }
 0xacc   : > { %v5282_v1 = vpack.c.bf16 %v5540_v9, %v5539_v3  ;;  %v4179_v9 = vld [vmem:[#allocation2 + $0x20] sm:$0xff] }
 0xacd   : > { %5275 = vmatprep.subr.bf16.mxu0 %v5274_v11 }
 0xace   : > { %5277 = vmatpush3.bf16.msra.mxu0 %v5274_v11 }
 0xacf   : > { %5283 = vmatprep.subr.bf16.mxu0 %v5282_v1 }
 0xad1   : > { %5088 = vmatmul.mubr.msk.f32.vlgmr.msra.gmra.mrb[54].mxu0 %vm841_vm3, %v5644_v43 }
 0xad2   : > { %5285 = vmatpush3.bf16.msra.mxu0 %v5282_v1  ;;  %5101 = vmatprep.mubr.msk.f32.mxu0 %vm841_vm3, %v5646_v12  ;;  %v4182_v1 = vld [vmem:[#allocation2 + $0x38] sm:$0xff] }
 0xad3   : > { %v5648_v14 = vpop.eup %5647 }
 0xad4   : > { %v5650_v15 = vpop.eup %5649  ;;  %v3802_v19 = vsel %vm841_vm3, %v5648_v14, 0.0 }
 0xad5   : > { %v5652_v22 = vpop.eup %5651  ;;  %3803 = vadd.xlane.f32.xlu0 %v3802_v19  ;;  %5094 = vmatprep.mubr.msk.f32.mxu1 %vm841_vm3, %v5650_v15  ;;  %v3799_v10 = vsel %vm841_vm3, %v5650_v15, 0.0  ;;  %v4181_v19 = vld [vmem:[#allocation2 + $0x30] sm:$0xff] }
 0xad6   : > { %5102 = vmatmul.mubr.msk.f32.vlgmr.msra.gmra.mrb[56].mxu0 %vm841_vm3, %v5652_v22  ;;  %5095 = vmatmul.mubr.msk.f32.vlgmr.msra.gmra.mrb[36].mxu1 %vm841_vm3, %v5648_v14  ;;  %v3808_v24 = vsel %vm841_vm3, %v5652_v22, 0.0 }
 0xad7   : > { %3800 = vadd.xlane.f32.xlu1 %v3799_v10  ;;  %5105 = vmatpush3.msra.mxu1 %v4184_v33 }
 0xad9   : > { %3809 = vadd.xlane.f32.xlu0 %v3808_v24 }
 0xadb   : > { %3806 = vadd.xlane.f32.xlu1 %v3805_v27 }
 0xaf9   : > { %v3789_v29 = vpop.xlane.xlu0 %3788 }
 0xafa   : > { %v3792_v32 = vpop.xlane.xlu1 %3791  ;;  %5653 = vrcp.f32 %v3789_v29 }
 0xafb   : > { %5655 = vrcp.f32 %v3792_v32 }
 0xb04   : > { %v5654_v36 = vpop.eup %5653 }
 0xb05   : > { %v5656_v30 = vpop.eup %5655 }
 0xb20   : > { %v3795_v38 = vpop.xlane.xlu0 %3794 }
 0xb21   : > { %5657 = vrcp.f32 %v3795_v38 }
 0xb24   : > { %v3798_v39 = vpop.xlane.xlu0 %3797 }
 0xb25   : > { %5659 = vrcp.f32 %v3798_v39 }
 0xb2b   : > { %v5658_v46 = vpop.eup %5657 }
 0xb2f   : > { %v5660_v48 = vpop.eup %5659 }
 0xb32   : > { %v5082_v35 = vpop.f32.mrb[52].mxu0 }
 0xb33   : > { %v3889_v37 = vpop.f32.mrb[53].mxu0  ;;  %v4168_v17 = vmul.f32 %v5656_v30, %v5082_v35 }
 0xb34   : > { %v4167_v13 = vmul.f32 %v5654_v36, %v3889_v37 }
 0xb36   : > { %5106 = vmatprep.mubr.msk.f32.mxu1 %vm480_vm1, %v4167_v13 }
 0xb37   : > { %5107 = vmatmul.mubr.msk.f32.vlgmr.msra.gmra.mrb[38].mxu1 %vm480_vm1, %v4168_v17 }
 0xb62   : > { %v3804_v41 = vpop.xlane.xlu0 %3803 }
 0xb64   : > { %v3801_v40 = vpop.xlane.xlu1 %3800 }
 0xb65   : > { %5661 = vrcp.f32 %v3801_v40 }
 0xb66   : > { %5663 = vrcp.f32 %v3804_v41  ;;  %v3810_v45 = vpop.xlane.xlu0 %3809 }
 0xb68   : > { %v3807_v44 = vpop.xlane.xlu1 %3806 }
 0xb69   : > { %5665 = vrcp.f32 %v3807_v44 }
 0xb6a   : > { %5667 = vrcp.f32 %v3810_v45 }
 0xb6f   : > { %v5662_v53 = vpop.eup %5661 }
 0xb70   : > { %v5664_v49 = vpop.eup %5663 }
 0xb73   : > { %v5666_v42 = vpop.eup %5665 }
 0xb74   : > { %v5668_v57 = vpop.eup %5667 }
 0xba4   : > { %v5089_v18 = vpop.f32.mrb[54].mxu0 }
 0xba5   : > { %v3976_v47 = vpop.f32.mrb[55].mxu0  ;;  %v4170_v34 = vmul.f32 %v5660_v48, %v5089_v18 }
 0xba6   : > { %v4169_v16 = vmul.f32 %v5658_v46, %v3976_v47 }
 0xba8   : > { %5109 = vmatprep.mubr.msk.f32.mxu1 %vm480_vm1, %v4169_v16 }
 0xba9   : > { %v5103_v25 = vpop.f32.mrb[56].mxu0  ;;  %v5096_v50 = vpop.f32.mrb[36].mxu1  ;;  %5110 = vmatmul.mubr.msk.f32.gmra.mrb[40].mxu1 %vm480_vm1, %v4170_v34 }
 0xbaa   : > { %v4150_v55 = vpop.f32.mrb[57].mxu0  ;;  %v4063_v21 = vpop.f32.mrb[37].mxu1  ;;  %v4172_v56 = vmul.f32 %v5664_v49, %v5096_v50  ;;  %v4174_v28 = vmul.f32 %v5668_v57, %v5103_v25 }
 0xbab   : > { %v4171_v51 = vmul.f32 %v5662_v53, %v4063_v21  ;;  %v4173_v23 = vmul.f32 %v5666_v42, %v4150_v55 }
 0xbad   : > { %5112 = vmatprep.mubr.msk.f32.mxu1 %vm480_vm1, %v4171_v51 }
 0xbae   : > { %5113 = vmatmul.mubr.msk.f32.gmra.mrb[42].mxu1 %vm480_vm1, %v4172_v56 }
 0xbaf   : > { %5115 = vmatprep.mubr.msk.f32.mxu1 %vm480_vm1, %v4173_v23 }
 0xbb2   : > { %5116 = vmatmul.mubr.msk.f32.gmra.mrb[44].mxu1 %vm480_vm1, %v4174_v28 }
 0xc0a   : > { %v5108_v26 = vpop.f32.mrb[38].mxu1 }
 0xc0b   : > { %v4315_v43 = vadd.f32 %v5108_v26, %v4176_v58  ;;  %v4275_v33 = vpop.f32.mrb[39].mxu1 }
 0xc0c   : > { %v4314_v60 = vadd.f32 %v4275_v33, %v4175_v59 }
 0xc0d   : > { %4323 = vst.msk [vmem:[#allocation2 + $0x8] sm:$0xff] %vm336_vm0, %v4315_v43 }
 0xc0e   : > { %4322 = vst.msk [vmem:[#allocation2] sm:$0xff] %vm336_vm0, %v4314_v60 }
 0xc14   : > { %v4331_v31 = vld [vmem:[#allocation2 + $0x8] sm:$0xff] }
 0xc15   : > { %v4346_v20 = vadd.f32 %v4631_v61, %v4331_v31  ;;  %v4330_v54 = vld [vmem:[#allocation2] sm:$0xff] }
 0xc16   : > { %v4345_v62 = vadd.f32 %v4631_v61, %v4330_v54 }
 0xc17   : > { %4354 = vst.msk [vmem:[%s6646_s30 + $0x8] sm:$0xff] %vm336_vm0, %v4346_v20 }
 0xc18   : > { %4353 = vst.msk [vmem:[%s6646_s30] sm:$0xff] %vm336_vm0, %v4345_v62 }
 0xc7c   : > { %v5111_v63 = vpop.f32.mrb[40].mxu1 }
 0xc7d   : > { %v4317_v0 = vadd.f32 %v5111_v63, %v4178_v52  ;;  %v4285_v5 = vpop.f32.mrb[41].mxu1 }
 0xc7e   : > { %v4316_v4 = vadd.f32 %v4285_v5, %v4177_v2 }
 0xc7f   : > { %4325 = vst.msk [vmem:[#allocation2 + $0x18] sm:$0xff] %vm336_vm0, %v4317_v0 }
 0xc80   : > { %4324 = vst.msk [vmem:[#allocation2 + $0x10] sm:$0xff] %vm336_vm0, %v4316_v4 }
 0xc81   : > { %v5114_v7 = vpop.f32.mrb[42].mxu1 }
 0xc82   : > { %v4319_v8 = vadd.f32 %v5114_v7, %v4180_v6  ;;  %v4295_v3 = vpop.f32.mrb[43].mxu1 }
 0xc83   : > { %v4318_v11 = vadd.f32 %v4295_v3, %v4179_v9 }
 0xc84   : > { %4327 = vst.msk [vmem:[#allocation2 + $0x28] sm:$0xff] %vm336_vm0, %v4319_v8 }
 0xc85   : > { %4326 = vst.msk [vmem:[#allocation2 + $0x20] sm:$0xff] %vm336_vm0, %v4318_v11  ;;  %v5117_v12 = vpop.f32.mrb[44].mxu1 }
 0xc86   : > { %v4333_v14 = vld [vmem:[#allocation2 + $0x18] sm:$0xff]  ;;  %v4321_v15 = vadd.f32 %v5117_v12, %v4182_v1  ;;  %v4305_v22 = vpop.f32.mrb[45].mxu1 }
 0xc87   : > { %v4348_v10 = vadd.f32 %v4631_v61, %v4333_v14  ;;  %v4332_v24 = vld [vmem:[#allocation2 + $0x10] sm:$0xff]  ;;  %v4320_v27 = vadd.f32 %v4305_v22, %v4181_v19 }
 0xc88   : > { %v4347_v29 = vadd.f32 %v4631_v61, %v4332_v24  ;;  %4329 = vst.msk [vmem:[#allocation2 + $0x38] sm:$0xff] %vm336_vm0, %v4321_v15 }
 0xc89   : > { %4328 = vst.msk [vmem:[#allocation2 + $0x30] sm:$0xff] %vm336_vm0, %v4320_v27  ;;  %4356 = vst.msk [vmem:[%s6646_s30 + $0x18] sm:$0xff] %vm336_vm0, %v4348_v10 }
 0xc8a   : > { %4355 = vst.msk [vmem:[%s6646_s30 + $0x10] sm:$0xff] %vm336_vm0, %v4347_v29 }
 0xc8b   : > { %v4335_v32 = vld [vmem:[#allocation2 + $0x28] sm:$0xff] }
 0xc8c   : > { %v4350_v35 = vadd.f32 %v4631_v61, %v4335_v32  ;;  %v4334_v36 = vld [vmem:[#allocation2 + $0x20] sm:$0xff] }
 0xc8d   : > { %v4349_v37 = vadd.f32 %v4631_v61, %v4334_v36 }
 0xc8e   : > { %4358 = vst.msk [vmem:[%s6646_s30 + $0x28] sm:$0xff] %vm336_vm0, %v4350_v35 }
 0xc8f   : > { %v4337_v30 = vld [vmem:[#allocation2 + $0x38] sm:$0xff]  ;;  %4357 = vst.msk [vmem:[%s6646_s30 + $0x20] sm:$0xff] %vm336_vm0, %v4349_v37 }
 0xc90   : > { %v4352_v13 = vadd.f32 %v4631_v61, %v4337_v30  ;;  %v4336_v17 = vld [vmem:[#allocation2 + $0x30] sm:$0xff] }
 0xc91   : > { %v4351_v38 = vadd.f32 %v4631_v61, %v4336_v17 }
 0xc92   : > { %4360 = vst.msk [vmem:[%s6646_s30 + $0x38] sm:$0xff] %vm336_vm0, %v4352_v13 }
 0xc93   : > { %4359 = vst.msk [vmem:[%s6646_s30 + $0x30] sm:$0xff] %vm336_vm0, %v4351_v38 }
 0xc94   : > { %5796 = shalt.err (!%p5793_p4)
}
 0xc95   : > { %s5797_s7 = scalar_lea.hbm %s6671_s8, 1024  ;;  %s5801_s29 = scalar_lea.hbm %s6727_s6, 2048 }
 0xc96   : > { %p5798_p9 = scmp.ne.s32.totalorder %s6671_s8, %s5797_s7  ;;  %p5802_p8 = scmp.lt.u32.totalorder %s6671_s8, %s6727_s6 }
 0xc97   : > { %p5803_p13 = scmp.lt.u32.totalorder %s5801_s29, %s5797_s7  ;;  %p5805_p10 = scmp.lt.u32.totalorder %s5797_s7, %s6671_s8 }
 0xc98   : > { %p5799_p0 = pnand %p5798_p9, %p6069_p5 }
 0xc99   : > { %p5804_p6 = por %p5803_p13, %p5802_p8 }
 0xc9a   : > { %p5800_p11 = pneg %p5799_p0 }
 0xc9b   : > { %p5806_p3 = por %p5805_p10, %p5804_p6 }
 0xc9d   : > { %p5807_p7 = pnand %p5806_p3, %p5800_p11 }
 0xc9f   : > { %5810 = shalt.err (!%p5807_p7)
}
 0xca0   : > { %s5878_s26 = smov 128   ;;  %s5879_s10 = smov 8  }
 0xca1   : > { %5302 = dma.vmem_to_hbm [thread:$0]  (%p6069_p5), %s6673_s9, 1024, %s6671_s8, %s4362_s25, %s5878_s26, %s5878_s26, %s5879_s10  }
 0xca2 PF: > { %s4391_s16 = sand.u32 1, %s5845_s21   ;;  %p6747_p12 = scmp.ne.s32.totalorder %s6732_s28, 0 }
 0xca3   : > { %p6748_p1 = scmp.ge.s32.totalorder %s5857_s24, 2  ;;  %s4392_s17 = scalar_lea.sflag [#allocation5], %s4391_s16 }
 0xca5   : > { %p5319_p2 = pnand %p6748_p1, %p6747_p12 }
 0xca7   : > { %5840 = dma.done.wait (!%p5319_p2), %s4392_s17, 1024  }
 0xca8   : > { %5842 = vsyncadd (!%p5319_p2), %s4392_s17, 4294966272  ;;  %p21_p4 = scmp.ge.s32.totalorder %s6055_s18, 4   ;;  %s6749_s21 = smov %s5849_s22 }
 0xca9   : > { %s6750_s22 = smov %s5853_s23  ;;  %s6751_s23 = smov %s6065_s14 }
 0xcaa   : > { %s6752_s24 = smov %s6055_s18  ;;  %23 = sbr.rel (!%p21_p4) target bundleno = 7 (0x7), region = 107 }
 0xcb1   :  { %4397 = vsyncpa [#allocation4], 1 }
 0xcb2   :  { %4399 = vsyncpa [#allocation4 + $0x1], 1 }
 0xcb3   :  { %4400 = vsyncpa [#allocation7], 1 }
 0xcb4   :  { %4401 = vsyncpa [#allocation10], 1 }
 0xcb5   :  { %4402 = vsyncpa [#allocation5], 1 }
 0xcb6   :  { %4404 = vsyncpa [#allocation5 + $0x1], 1 }

</bundles_post_ra>
